<compile_context>
chip_gen: v5e
topology: v5e:2x2
jax: 0.10.0
libtpu: 0.0.40
codegen_flags: <defaults>
</compile_context>

<pallas_src>
import math

import jax
import jax.numpy as jnp
from jax import lax
from jax.experimental import pallas as pl
from jax.experimental.pallas import tpu as pltpu

PACK = 128  # lane-dense packed output width (>= 6 + max_table_len)


# -----------------------------------------------------------------------------
# Fused Pallas kernel: 8x seq_conditional_weighted_num(...).sum(1) + both heads
# -----------------------------------------------------------------------------
def _from_fused_kernel(lens_ref,
                       q_ref, hs_ref, tab_ref, col_ref, agg_ref,
                       wq_ref, bq_ref, whs_ref, bhs_ref,
                       wsch_ref, bsch_ref, wnum_ref, bnum_ref,
                       watt_ref, batt_ref, place_ref,
                       out_ref):
    g = pl.program_id(0)
    Bb, Lq, E = q_ref.shape
    _, Lhs, _ = hs_ref.shape
    _, Lt, H = tab_ref.shape
    _, Lc, _ = col_ref.shape
    f32 = jnp.float32
    bf16 = jnp.bfloat16

    # ---------------- block-level GEMMs (batch folded into M) ----------------
    q2d = q_ref[...].reshape(Bb * Lq, E)          # bf16
    hs2d = hs_ref[...].reshape(Bb * Lhs, E)       # bf16
    tab2d = tab_ref[...].reshape(Bb * Lt, H)      # bf16
    agg2d = agg_ref[...].reshape(Bb, H)           # bf16

    # packed projection, cols = [tab_num | tab_att | col_num | col_att | out_tab | out_col]
    proj_q = (jnp.dot(q2d, wq_ref[...], preferred_element_type=f32)
              + bq_ref[...]).astype(bf16)                                   # [Bb*Lq, 6H]
    proj_hs = (jnp.dot(hs2d, whs_ref[...], preferred_element_type=f32)
               + bhs_ref[...]).astype(bf16)                                 # [Bb*Lhs, 6H]

    # schema_out(relu(agg)) + sum of all output-linear biases
    sch = (jnp.dot(jnp.maximum(agg2d, 0).astype(bf16), wsch_ref[...],
                   preferred_element_type=f32) + bsch_ref[...])             # [Bb, H] f32

    # table_att = Sequential(Tanh, Linear, Sigmoid) applied to table_tensors
    att_tab_all = jax.nn.sigmoid(
        jnp.dot(jnp.tanh(tab2d.astype(f32)).astype(bf16), watt_ref[...],
                preferred_element_type=f32) + batt_ref[...]).astype(bf16)   # [Bb*Lt, H]

    # -------------------------- per-element helpers ---------------------------
    def softmax_colsum(s, klen):
        # s [Lk, Ls] f32; softmax over the query axis; padded K rows excluded.
        lk, ls = s.shape
        m = jnp.max(s, axis=-1, keepdims=True)
        e = jnp.exp(s - m)
        p = e * pl.reciprocal(jnp.sum(e, axis=-1, keepdims=True), approx=True)
        kid = lax.broadcasted_iota(jnp.int32, (lk, ls), 0)
        p = jnp.where(kid >= klen, 0.0, p)
        return jnp.sum(p, axis=0, keepdims=True)                            # [1, Ls]

    def scores_pair(k_mat, p_b, col0, slen, klen, Ls):
        # fused (num, att) score matmul: one [Lk, 2Ls] MXU push for the pair
        pn_pa = jnp.concatenate(
            [p_b[:, col0:col0 + H], p_b[:, col0 + H:col0 + 2 * H]], axis=0)  # [2Ls, H]
        s = lax.dot_general(k_mat, pn_pa, (((1,), (1,)), ((), ())),
                            preferred_element_type=f32)                     # [Lk, 2Ls]
        lk = k_mat.shape[0]
        sid = lax.broadcasted_iota(jnp.int32, (lk, 2 * Ls), 1)
        qpos = sid - jnp.where(sid >= Ls, Ls, 0)
        s = jnp.where(qpos >= slen, -100.0, s)                               # query mask only
        return (softmax_colsum(s[:, 0:Ls], klen),
                softmax_colsum(s[:, Ls:2 * Ls], klen))

    def branch(p_b, slen, tab_b, col_b, tablen, collen, Ls):
        ct_num, ct_att = scores_pair(tab_b, p_b, 0, slen, tablen, Ls)
        cc_num, cc_att = scores_pair(col_b, p_b, 2 * H, slen, collen, Ls)
        C = jnp.concatenate([ct_num, ct_att, cc_num, cc_att], axis=0).astype(bf16)  # [4, Ls]
        kw = p_b[:, 4 * H:6 * H]                                             # [Ls, 2H]
        out4 = jnp.dot(C, kw, preferred_element_type=f32)                    # [4, 2H]
        xnum = out4[0:1, 0:H] + out4[2:3, H:2 * H]
        xatt = out4[1:2, 0:H] + out4[3:4, H:2 * H]
        return xnum, xatt                                                    # each [1, H] f32

    # ------------------------ per-batch-element work --------------------------
    xnum_rows = []
    score_rows = []
    for i in range(Bb):                                   # static, fully unrolled
        b = g * Bb + i
        qlen = lens_ref[b, 0]
        hslen = lens_ref[b, 1]
        collen = lens_ref[b, 2]
        tablen = lens_ref[b, 3]

        tab_b = tab_ref[i]                                # [Lt, H] bf16
        col_b = col_ref[i]                                # [Lc, H] bf16
        pq_b = proj_q[i * Lq:(i + 1) * Lq, :]
        phs_b = proj_hs[i * Lhs:(i + 1) * Lhs, :]

        qn, qa = branch(pq_b, qlen, tab_b, col_b, tablen, collen, Lq)
        hn, ha = branch(phs_b, hslen, tab_b, col_b, tablen, collen, Lhs)
        sch_i = sch[i:i + 1, :]
        x_num = qn + hn + sch_i                           # [1, H]
        x_att = qa + ha + sch_i                           # [1, H]

        att_tab_i = att_tab_all[i * Lt:(i + 1) * Lt, :]   # [Lt, H]
        sc = lax.dot_general(x_att.astype(bf16), att_tab_i, (((1,), (1,)), ((), ())),
                             preferred_element_type=f32)  # [1, Lt]
        tid = lax.broadcasted_iota(jnp.int32, (1, Lt), 1)
        sc = jnp.where(tid >= tablen, -100.0, sc)

        xnum_rows.append(x_num)
        score_rows.append(sc)

    xnum_all = jnp.concatenate(xnum_rows, axis=0)          # [Bb, H]
    scores_all = jnp.concatenate(score_rows, axis=0)       # [Bb, Lt]

    # num head -> lanes [0, 6); table scores placed into lanes [6, 6+Lt)
    out = (jnp.dot(jnp.tanh(xnum_all).astype(bf16), wnum_ref[...],
                   preferred_element_type=f32) + bnum_ref[...]
           + jnp.dot(scores_all.astype(bf16), place_ref[...],
                     preferred_element_type=f32))                            # [Bb, PACK]
    out_ref[...] = out.reshape(Bb, 1, PACK)                # dense 128-lane store


def _pick_block_b(B):
    # largest divisor of B that is <= 8 while keeping the grid >= 2 (both v7x TCs busy)
    best = 1
    upper = min(8, max(1, B // 2))
    for d in range(1, upper + 1):
        if B % d == 0:
            best = d
    return best


def fused_from_heads(lens, q_enc, hs_enc, table_tensors, col_tensors, agg,
                     wq_p, bq_p, whs_p, bhs_p, wsch, bsch, wnum_p, bnum_p,
                     watt, batt, place):
    B, Lq, E = q_enc.shape
    _, Lhs, _ = hs_enc.shape
    _, Lt, H = table_tensors.shape
    _, Lc, _ = col_tensors.shape
    assert E == H, "non-BERT path: encoded_num == N_h"
    assert 6 + Lt <= PACK
    f32, bf16 = jnp.float32, jnp.bfloat16

    Bb = _pick_block_b(B)
    G = B // Bb

    def amap(i, lens_ref):
        return (i, 0, 0)

    def wmap(i, lens_ref):
        return (0, 0)

    def wspec(shape):
        # grid-invariant weights: single-buffered (no refetch across grid steps)
        return pl.BlockSpec(shape, wmap, pipeline_mode=pl.Buffered(1))

    out = pl.pallas_call(
        _from_fused_kernel,
        out_shape=jax.ShapeDtypeStruct((B, 1, PACK), f32),
        grid_spec=pltpu.PrefetchScalarGridSpec(
            num_scalar_prefetch=1,
            grid=(G,),
            in_specs=[
                pl.BlockSpec((Bb, Lq, E), amap),        # q_enc
                pl.BlockSpec((Bb, Lhs, E), amap),       # hs_enc
                pl.BlockSpec((Bb, Lt, H), amap),        # table_tensors
                pl.BlockSpec((Bb, Lc, H), amap),        # col_tensors
                pl.BlockSpec((Bb, 1, H), amap),         # aggregated schema
                wspec((E, 6 * H)), wspec((1, 6 * H)),   # wq_p, bq_p
                wspec((E, 6 * H)), wspec((1, 6 * H)),   # whs_p, bhs_p
                wspec((H, H)), wspec((1, H)),           # wsch, bsch
                wspec((H, PACK)), wspec((1, PACK)),     # wnum_p, bnum_p
                wspec((H, H)), wspec((1, H)),           # watt, batt
                wspec((Lt, PACK)),                      # place
            ],
            out_specs=pl.BlockSpec((Bb, 1, PACK), amap),
        ),
        compiler_params=pltpu.CompilerParams(
            dimension_semantics=("parallel",),
            vmem_limit_bytes=48 * 1024 * 1024),
    )(lens.astype(jnp.int32),
      q_enc.astype(bf16), hs_enc.astype(bf16),
      table_tensors.astype(bf16), col_tensors.astype(bf16),
      agg.astype(bf16)[:, None, :],
      wq_p.astype(bf16), bq_p.astype(f32),
      whs_p.astype(bf16), bhs_p.astype(f32),
      wsch.astype(bf16), bsch.astype(f32),
      wnum_p.astype(bf16), bnum_p.astype(f32),
      watt.astype(bf16), batt.astype(f32),
      place.astype(bf16))

    table_num_score = out[:, 0, 0:6]
    table_score = out[:, 0, 6:6 + Lt]
    return table_num_score, table_score


# -----------------------------------------------------------------------------
# Plain-JAX glue: bi-LSTM encoder, fwd+bwd fused into ONE scan per layer
# (PyTorch gate order i,f,g,o; eval mode so dropout is inactive)
# -----------------------------------------------------------------------------
def _pack_bidir(pf, pb, Hc):
    # gate-major, direction-interleaved packing: [i_f i_b f_f f_b g_f g_b o_f o_b]
    def interleave_rows(wf, wb):
        X = wf.shape[1]
        return jnp.concatenate(
            [wf.reshape(4, Hc, X), wb.reshape(4, Hc, X)], axis=1).reshape(8 * Hc, X)

    w_ih = interleave_rows(pf["w_ih"], pb["w_ih"])                         # [8Hc, in]
    bias = jnp.concatenate(
        [(pf["b_ih"] + pf["b_hh"]).reshape(4, Hc),
         (pb["b_ih"] + pb["b_hh"]).reshape(4, Hc)], axis=1).reshape(8 * Hc)

    # block-diagonal recurrent weight: h2 layout [fwd Hc | bwd Hc]
    whh = jnp.zeros((2 * Hc, 8 * Hc), jnp.float32)
    wf4 = pf["w_hh"].reshape(4, Hc, Hc)
    wb4 = pb["w_hh"].reshape(4, Hc, Hc)
    for gidx in range(4):
        whh = whh.at[0:Hc, gidx * 2 * Hc:gidx * 2 * Hc + Hc].set(wf4[gidx].T)
        whh = whh.at[Hc:2 * Hc, gidx * 2 * Hc + Hc:(gidx + 1) * 2 * Hc].set(wb4[gidx].T)
    return w_ih, bias, whh


def _bilstm_layer(x, lengths, pf, pb):
    B, T, _ = x.shape
    Hc = pf["w_hh"].shape[1]
    w_ih, bias, whh = _pack_bidir(pf, pb, Hc)

    # hoist the input projection out of the recurrence: one big GEMM for both dirs
    xp = x @ w_ih.T + bias                                  # [B, T, 8Hc]
    xp_t = jnp.transpose(xp, (1, 0, 2))                     # [T, B, 8Hc]
    is_fwd_gate_col = ((jnp.arange(8 * Hc) // Hc) % 2 == 0)[None, None, :]
    xs = jnp.where(is_fwd_gate_col, xp_t, xp_t[::-1])       # bwd gate cols get reversed time
    ts = jnp.arange(T)
    is_fwd_h_col = (jnp.arange(2 * Hc) < Hc)[None, :]
    len_col = lengths[:, None]

    def step(carry, inp):
        h2, c2 = carry
        xg, t = inp
        gates = xg + h2 @ whh                               # [B, 8Hc]
        i, f, gg, o = jnp.split(gates, 4, axis=-1)          # each [B, 2Hc]
        i = jax.nn.sigmoid(i)
        f = jax.nn.sigmoid(f)
        gg = jnp.tanh(gg)
        o = jax.nn.sigmoid(o)
        c_new = f * c2 + i * gg
        h_new = o * jnp.tanh(c_new)
        valid = jnp.where(is_fwd_h_col, t < len_col, (T - 1 - t) < len_col)
        h2n = jnp.where(valid, h_new, h2)
        c2n = jnp.where(valid, c_new, c2)
        out = jnp.where(valid, h_new, 0.0)                  # packed/pad semantics
        return (h2n, c2n), out

    h0 = jnp.zeros((B, 2 * Hc), jnp.float32)
    c0 = jnp.zeros((B, 2 * Hc), jnp.float32)
    _, outs = lax.scan(step, (h0, c0), (xs, ts))            # [T, B, 2Hc]
    fwd = outs[:, :, :Hc]
    bwd = outs[::-1, :, Hc:]
    return jnp.transpose(jnp.concatenate([fwd, bwd], axis=-1), (1, 0, 2))   # [B, T, 2Hc]


def run_bilstm(layer_params, x, lengths):
    out = x
    for layer_p in layer_params:
        out = _bilstm_layer(out, lengths, layer_p["fwd"], layer_p["bwd"])
    return out                                              # [B, T, N_h]


# -----------------------------------------------------------------------------
# Parameter init (deterministic)
# -----------------------------------------------------------------------------
def init_linear(key, fan_in, fan_out):
    k1, k2 = jax.random.split(key)
    bound = 1.0 / math.sqrt(fan_in)
    return {
        "w": jax.random.uniform(k1, (fan_in, fan_out), jnp.float32, -bound, bound),
        "b": jax.random.uniform(k2, (fan_out,), jnp.float32, -bound, bound),
    }


def init_lstm(key, input_size, hidden_size, num_layers):
    layers = []
    for layer in range(num_layers):
        in_sz = input_size if layer == 0 else 2 * hidden_size
        layer_p = {}
        for d in ("fwd", "bwd"):
            key, k1, k2, k3, k4 = jax.random.split(key, 5)
            bound = 1.0 / math.sqrt(hidden_size)
            layer_p[d] = {
                "w_ih": jax.random.uniform(k1, (4 * hidden_size, in_sz), jnp.float32, -bound, bound),
                "w_hh": jax.random.uniform(k2, (4 * hidden_size, hidden_size), jnp.float32, -bound, bound),
                "b_ih": jax.random.uniform(k3, (4 * hidden_size,), jnp.float32, -bound, bound),
                "b_hh": jax.random.uniform(k4, (4 * hidden_size,), jnp.float32, -bound, bound),
            }
        layers.append(layer_p)
    return layers


def init_from_predictor_params(key, N_word, N_h, N_depth):
    keys = jax.random.split(key, 32)
    ki = iter(keys)
    p = {}
    p["q_lstm"] = init_lstm(next(ki), N_word, N_h // 2, N_depth)
    p["hs_lstm"] = init_lstm(next(ki), N_word, N_h // 2, N_depth)
    # TODO(synk): approximate SchemaEncoder / SchemaAggregator (source not in the module)
    p["schema_tab"] = init_linear(next(ki), N_word, N_h)
    p["schema_col"] = init_linear(next(ki), N_word, N_h)
    p["schema_agg"] = init_linear(next(ki), N_h, N_h)
    for name in ("q_table_num_att", "q_col_num_att", "q_table_att", "q_col_att"):
        p[name] = init_linear(next(ki), N_h, N_h)
    for name in ("hs_table_num_att", "hs_col_num_att", "hs_table_att", "hs_col_att"):
        p[name] = init_linear(next(ki), N_h, N_h)
    for name in ("schema_out", "q_table_out", "q_col_out", "hs_table_out", "hs_col_out"):
        p[name] = init_linear(next(ki), N_h, N_h)
    p["table_num_out"] = init_linear(next(ki), N_h, 6)
    p["table_att"] = init_linear(next(ki), N_h, N_h)
    return p


# -----------------------------------------------------------------------------
# FromPredictor.forward
# -----------------------------------------------------------------------------
def from_predictor_forward(params, q_emb_var, q_len, hs_emb_var, hs_len,
                           col_emb_var, col_len, table_emb_var, table_len,
                           use_hs=True):
    # encoders
    q_enc = run_bilstm(params["q_lstm"], q_emb_var, q_len)        # [B, Lq, N_h]
    hs_enc = run_bilstm(params["hs_lstm"], hs_emb_var, hs_len)    # [B, Lhs, N_h]

    # TODO(synk): SchemaEncoder / SchemaAggregator approximated (linear + mean pool)
    table_tensors = jnp.tanh(table_emb_var @ params["schema_tab"]["w"] + params["schema_tab"]["b"])
    col_tensors = jnp.tanh(col_emb_var @ params["schema_col"]["w"] + params["schema_col"]["b"])
    pooled = jnp.mean(table_tensors, axis=1) + jnp.mean(col_tensors, axis=1)
    aggregated_schema = jnp.tanh(pooled @ params["schema_agg"]["w"] + params["schema_agg"]["b"])

    H = aggregated_schema.shape[-1]
    Lt = table_tensors.shape[1]
    s = 1.0 if use_hs else 0.0

    # packed per-source weights: cols = [tab_num | tab_att | col_num | col_att | tab_out | col_out]
    # (int(use_hs) folded into the hs out-weights — exact).
    def pack_source(prefix, s_out):
        w = jnp.concatenate([
            params[prefix + "_table_num_att"]["w"],
            params[prefix + "_table_att"]["w"],
            params[prefix + "_col_num_att"]["w"],
            params[prefix + "_col_att"]["w"],
            s_out * params[prefix + "_table_out"]["w"],
            s_out * params[prefix + "_col_out"]["w"],
        ], axis=1)                                                 # [E, 6H]
        b = jnp.concatenate([
            params[prefix + "_table_num_att"]["b"],
            params[prefix + "_table_att"]["b"],
            params[prefix + "_col_num_att"]["b"],
            params[prefix + "_col_att"]["b"],
            jnp.zeros((2 * H,), jnp.float32),
        ], axis=0).reshape(1, 6 * H)
        return w, b

    wq_p, bq_p = pack_source("q", 1.0)
    whs_p, bhs_p = pack_source("hs", s)

    # schema_out weight + the sum of all output-linear biases (each applied once)
    wsch = params["schema_out"]["w"]
    bsch = (params["schema_out"]["b"] + params["q_table_out"]["b"] + params["q_col_out"]["b"]
            + s * (params["hs_table_out"]["b"] + params["hs_col_out"]["b"])).reshape(1, H)

    # lane-dense packed output: num head in lanes [0,6), table scores in [6,6+Lt)
    wnum_p = jnp.zeros((H, PACK), jnp.float32).at[:, 0:6].set(params["table_num_out"]["w"])
    bnum_p = jnp.zeros((1, PACK), jnp.float32).at[:, 0:6].set(params["table_num_out"]["b"].reshape(1, 6))
    place = jnp.zeros((Lt, PACK), jnp.float32).at[:, 6:6 + Lt].set(jnp.eye(Lt, dtype=jnp.float32))

    # pack all lengths into one [B, 4] scalar-prefetch array
    lens = jnp.stack([q_len, hs_len, col_len, table_len], axis=1).astype(jnp.int32)

    return fused_from_heads(
        lens, q_enc, hs_enc, table_tensors, col_tensors, aggregated_schema,
        wq_p, bq_p, whs_p, bhs_p, wsch, bsch, wnum_p, bnum_p,
        params["table_att"]["w"], params["table_att"]["b"].reshape(1, H),
        place)


# -----------------------------------------------------------------------------
if __name__ == "__main__":
    N_word, N_h, N_depth = 16, 32, 2
    B = 2
    max_q_len, max_hs_len, max_col_len, max_table_len = 8, 5, 7, 4

    key = jax.random.PRNGKey(0)
    kp, kq, khs, kc, kt = jax.random.split(key, 5)
    params = init_from_predictor_params(kp, N_word, N_h, N_depth)

    q_emb_var = jax.random.normal(kq, (B, max_q_len, N_word), jnp.float32)
    hs_emb_var = jax.random.normal(khs, (B, max_hs_len, N_word), jnp.float32)
    col_emb_var = jax.random.normal(kc, (B, max_col_len, N_word), jnp.float32)
    table_emb_var = jax.random.normal(kt, (B, max_table_len, N_word), jnp.float32)

    q_len = jnp.array([8, 6], jnp.int32)
    hs_len = jnp.array([5, 3], jnp.int32)
    col_len = jnp.array([7, 5], jnp.int32)
    table_len = jnp.array([4, 3], jnp.int32)

    fwd = jax.jit(from_predictor_forward, static_argnames=("use_hs",))
    table_num_score, table_score = fwd(
        params, q_emb_var, q_len, hs_emb_var, hs_len,
        col_emb_var, col_len, table_emb_var, table_len, use_hs=True)

    jax.block_until_ready((table_num_score, table_score))
    assert table_num_score.shape == (B, 6)
    assert table_score.shape == (B, max_table_len)
    print("KERNEL_OK")
</pallas_src>

<mosaic_0001>
module attributes {stable_mosaic.version = 11 : i64} {
  func.func @_from_fused_kernel(%arg0: i32, %arg1: memref<2x4xi32, #tpu.memory_space<smem>>, %arg2: memref<1x8x32xbf16, #tpu.memory_space<vmem>>, %arg3: memref<1x5x32xbf16, #tpu.memory_space<vmem>>, %arg4: memref<1x4x32xbf16, #tpu.memory_space<vmem>>, %arg5: memref<1x7x32xbf16, #tpu.memory_space<vmem>>, %arg6: memref<1x1x32xbf16, #tpu.memory_space<vmem>>, %arg7: memref<32x192xbf16, #tpu.memory_space<vmem>>, %arg8: memref<1x192xf32, #tpu.memory_space<vmem>>, %arg9: memref<32x192xbf16, #tpu.memory_space<vmem>>, %arg10: memref<1x192xf32, #tpu.memory_space<vmem>>, %arg11: memref<32x32xbf16, #tpu.memory_space<vmem>>, %arg12: memref<1x32xf32, #tpu.memory_space<vmem>>, %arg13: memref<32x128xbf16, #tpu.memory_space<vmem>>, %arg14: memref<1x128xf32, #tpu.memory_space<vmem>>, %arg15: memref<32x32xbf16, #tpu.memory_space<vmem>>, %arg16: memref<1x32xf32, #tpu.memory_space<vmem>>, %arg17: memref<4x128xbf16, #tpu.memory_space<vmem>>, %arg18: memref<1x1x128xf32, #tpu.memory_space<vmem>>) attributes {dimension_semantics = [#tpu.dimension_semantics<parallel>], iteration_bounds = array<i64: 2>, scalar_prefetch = 1 : i64, scratch_operands = 0 : i64, tpu.core_type = #tpu.core_type<tc>, window_params = [{transform_indices = @transform_0, window_bounds = array<i64: 1, 8, 32>}, {transform_indices = @transform_1, window_bounds = array<i64: 1, 5, 32>}, {transform_indices = @transform_2, window_bounds = array<i64: 1, 4, 32>}, {transform_indices = @transform_3, window_bounds = array<i64: 1, 7, 32>}, {transform_indices = @transform_4, window_bounds = array<i64: 1, 1, 32>}, {pipeline_mode = #tpu.pipeline_mode<synchronous>, transform_indices = @transform_5, window_bounds = array<i64: 32, 192>}, {pipeline_mode = #tpu.pipeline_mode<synchronous>, transform_indices = @transform_6, window_bounds = array<i64: 1, 192>}, {pipeline_mode = #tpu.pipeline_mode<synchronous>, transform_indices = @transform_7, window_bounds = array<i64: 32, 192>}, {pipeline_mode = #tpu.pipeline_mode<synchronous>, transform_indices = @transform_8, window_bounds = array<i64: 1, 192>}, {pipeline_mode = #tpu.pipeline_mode<synchronous>, transform_indices = @transform_9, window_bounds = array<i64: 32, 32>}, {pipeline_mode = #tpu.pipeline_mode<synchronous>, transform_indices = @transform_10, window_bounds = array<i64: 1, 32>}, {pipeline_mode = #tpu.pipeline_mode<synchronous>, transform_indices = @transform_11, window_bounds = array<i64: 32, 128>}, {pipeline_mode = #tpu.pipeline_mode<synchronous>, transform_indices = @transform_12, window_bounds = array<i64: 1, 128>}, {pipeline_mode = #tpu.pipeline_mode<synchronous>, transform_indices = @transform_13, window_bounds = array<i64: 32, 32>}, {pipeline_mode = #tpu.pipeline_mode<synchronous>, transform_indices = @transform_14, window_bounds = array<i64: 1, 32>}, {pipeline_mode = #tpu.pipeline_mode<synchronous>, transform_indices = @transform_15, window_bounds = array<i64: 4, 128>}, {transform_indices = @transform_16, window_bounds = array<i64: 1, 1, 128>}]} {
    %c0 = arith.constant 0 : index
    %c0_0 = arith.constant 0 : index
    %c0_1 = arith.constant 0 : index
    %0 = vector.load %arg2[%c0, %c0_0, %c0_1] : memref<1x8x32xbf16, #tpu.memory_space<vmem>>, vector<1x8x32xbf16>
    %1 = vector.shape_cast %0 : vector<1x8x32xbf16> to vector<8x32xbf16>
    %c0_2 = arith.constant 0 : index
    %c0_3 = arith.constant 0 : index
    %c0_4 = arith.constant 0 : index
    %2 = vector.load %arg3[%c0_2, %c0_3, %c0_4] : memref<1x5x32xbf16, #tpu.memory_space<vmem>>, vector<1x5x32xbf16>
    %3 = vector.shape_cast %2 : vector<1x5x32xbf16> to vector<5x32xbf16>
    %c0_5 = arith.constant 0 : index
    %c0_6 = arith.constant 0 : index
    %c0_7 = arith.constant 0 : index
    %4 = vector.load %arg4[%c0_5, %c0_6, %c0_7] : memref<1x4x32xbf16, #tpu.memory_space<vmem>>, vector<1x4x32xbf16>
    %5 = vector.shape_cast %4 : vector<1x4x32xbf16> to vector<4x32xbf16>
    %c0_8 = arith.constant 0 : index
    %c0_9 = arith.constant 0 : index
    %c0_10 = arith.constant 0 : index
    %6 = vector.load %arg6[%c0_8, %c0_9, %c0_10] : memref<1x1x32xbf16, #tpu.memory_space<vmem>>, vector<1x1x32xbf16>
    %7 = vector.shape_cast %6 : vector<1x1x32xbf16> to vector<1x32xbf16>
    %c0_11 = arith.constant 0 : index
    %c0_12 = arith.constant 0 : index
    %8 = vector.load %arg7[%c0_11, %c0_12] : memref<32x192xbf16, #tpu.memory_space<vmem>>, vector<32x192xbf16>
    %cst = arith.constant dense<0.000000e+00> : vector<8x192xf32>
    %9 = tpu.matmul %1, %8, %cst {dimension_numbers = #tpu.dot_dimension_numbers<[1], [0], [0], [1], [0, 0, 1, 1], [], []>} : vector<8x32xbf16>, vector<32x192xbf16>, vector<8x192xf32> -> vector<8x192xf32>
    %c0_13 = arith.constant 0 : index
    %c0_14 = arith.constant 0 : index
    %10 = vector.load %arg8[%c0_13, %c0_14] : memref<1x192xf32, #tpu.memory_space<vmem>>, vector<1x192xf32>
    %11 = vector.broadcast %10 : vector<1x192xf32> to vector<8x192xf32>
    %12 = arith.addf %9, %11 : vector<8x192xf32>
    %13 = arith.truncf %12 : vector<8x192xf32> to vector<8x192xbf16>
    %c0_15 = arith.constant 0 : index
    %c0_16 = arith.constant 0 : index
    %14 = vector.load %arg9[%c0_15, %c0_16] : memref<32x192xbf16, #tpu.memory_space<vmem>>, vector<32x192xbf16>
    %cst_17 = arith.constant dense<0.000000e+00> : vector<5x192xf32>
    %15 = tpu.matmul %3, %14, %cst_17 {dimension_numbers = #tpu.dot_dimension_numbers<[1], [0], [0], [1], [0, 0, 1, 1], [], []>} : vector<5x32xbf16>, vector<32x192xbf16>, vector<5x192xf32> -> vector<5x192xf32>
    %c0_18 = arith.constant 0 : index
    %c0_19 = arith.constant 0 : index
    %16 = vector.load %arg10[%c0_18, %c0_19] : memref<1x192xf32, #tpu.memory_space<vmem>>, vector<1x192xf32>
    %17 = vector.broadcast %16 : vector<1x192xf32> to vector<5x192xf32>
    %18 = arith.addf %15, %17 : vector<5x192xf32>
    %19 = arith.truncf %18 : vector<5x192xf32> to vector<5x192xbf16>
    %cst_20 = arith.constant 0.000000e+00 : bf16
    %20 = vector.broadcast %cst_20 : bf16 to vector<1x32xbf16>
    %21 = arith.maximumf %7, %20 : vector<1x32xbf16>
    %c0_21 = arith.constant 0 : index
    %c0_22 = arith.constant 0 : index
    %22 = vector.load %arg11[%c0_21, %c0_22] : memref<32x32xbf16, #tpu.memory_space<vmem>>, vector<32x32xbf16>
    %cst_23 = arith.constant dense<0.000000e+00> : vector<1x32xf32>
    %23 = tpu.matmul %21, %22, %cst_23 {dimension_numbers = #tpu.dot_dimension_numbers<[1], [0], [0], [1], [0, 0, 1, 1], [], []>} : vector<1x32xbf16>, vector<32x32xbf16>, vector<1x32xf32> -> vector<1x32xf32>
    %c0_24 = arith.constant 0 : index
    %c0_25 = arith.constant 0 : index
    %24 = vector.load %arg12[%c0_24, %c0_25] : memref<1x32xf32, #tpu.memory_space<vmem>>, vector<1x32xf32>
    %25 = arith.addf %23, %24 : vector<1x32xf32>
    %26 = arith.extf %5 : vector<4x32xbf16> to vector<4x32xf32>
    %27 = math.tanh %26 : vector<4x32xf32>
    %28 = arith.truncf %27 : vector<4x32xf32> to vector<4x32xbf16>
    %c0_26 = arith.constant 0 : index
    %c0_27 = arith.constant 0 : index
    %29 = vector.load %arg15[%c0_26, %c0_27] : memref<32x32xbf16, #tpu.memory_space<vmem>>, vector<32x32xbf16>
    %cst_28 = arith.constant dense<0.000000e+00> : vector<4x32xf32>
    %30 = tpu.matmul %28, %29, %cst_28 {dimension_numbers = #tpu.dot_dimension_numbers<[1], [0], [0], [1], [0, 0, 1, 1], [], []>} : vector<4x32xbf16>, vector<32x32xbf16>, vector<4x32xf32> -> vector<4x32xf32>
    %c0_29 = arith.constant 0 : index
    %c0_30 = arith.constant 0 : index
    %31 = vector.load %arg16[%c0_29, %c0_30] : memref<1x32xf32, #tpu.memory_space<vmem>>, vector<1x32xf32>
    %32 = vector.broadcast %31 : vector<1x32xf32> to vector<4x32xf32>
    %33 = arith.addf %30, %32 : vector<4x32xf32>
    %34 = arith.negf %33 : vector<4x32xf32>
    %35 = math.exp %34 : vector<4x32xf32>
    %cst_31 = arith.constant 1.000000e+00 : f32
    %36 = vector.broadcast %cst_31 : f32 to vector<4x32xf32>
    %37 = arith.addf %36, %35 : vector<4x32xf32>
    %38 = arith.divf %36, %37 : vector<4x32xf32>
    %39 = arith.truncf %38 : vector<4x32xf32> to vector<4x32xbf16>
    %c1_i32 = arith.constant 1 : i32
    %40 = arith.muli %arg0, %c1_i32 : i32
    %c0_i32 = arith.constant 0 : i32
    %41 = arith.addi %40, %c0_i32 : i32
    %42 = arith.index_cast %41 : i32 to index
    %c0_32 = arith.constant 0 : index
    %43 = memref.load %arg1[%42, %c0_32] : memref<2x4xi32, #tpu.memory_space<smem>>
    %44 = arith.index_cast %41 : i32 to index
    %c1 = arith.constant 1 : index
    %45 = memref.load %arg1[%44, %c1] : memref<2x4xi32, #tpu.memory_space<smem>>
    %46 = arith.index_cast %41 : i32 to index
    %c2 = arith.constant 2 : index
    %47 = memref.load %arg1[%46, %c2] : memref<2x4xi32, #tpu.memory_space<smem>>
    %48 = arith.index_cast %41 : i32 to index
    %c3 = arith.constant 3 : index
    %49 = memref.load %arg1[%48, %c3] : memref<2x4xi32, #tpu.memory_space<smem>>
    %c0_33 = arith.constant 0 : index
    %c0_34 = arith.constant 0 : index
    %c0_35 = arith.constant 0 : index
    %50 = vector.load %arg4[%c0_33, %c0_34, %c0_35] : memref<1x4x32xbf16, #tpu.memory_space<vmem>>, vector<1x4x32xbf16>
    %51 = vector.shape_cast %50 : vector<1x4x32xbf16> to vector<4x32xbf16>
    %c0_36 = arith.constant 0 : index
    %c0_37 = arith.constant 0 : index
    %c0_38 = arith.constant 0 : index
    %52 = vector.load %arg5[%c0_36, %c0_37, %c0_38] : memref<1x7x32xbf16, #tpu.memory_space<vmem>>, vector<1x7x32xbf16>
    %53 = vector.shape_cast %52 : vector<1x7x32xbf16> to vector<7x32xbf16>
    %54 = vector.extract_strided_slice %13 {offsets = [0, 0], sizes = [8, 32], strides = [1, 1]} : vector<8x192xbf16> to vector<8x32xbf16>
    %55 = vector.extract_strided_slice %13 {offsets = [0, 32], sizes = [8, 32], strides = [1, 1]} : vector<8x192xbf16> to vector<8x32xbf16>
    %56 = tpu.concatenate %54, %55 in 0 : vector<8x32xbf16>, vector<8x32xbf16> -> vector<16x32xbf16>
    %cst_39 = arith.constant dense<0.000000e+00> : vector<4x16xf32>
    %57 = tpu.matmul %51, %56, %cst_39 {dimension_numbers = #tpu.dot_dimension_numbers<[1], [1], [0], [0], [0, 0, 1, 0], [], []>} : vector<4x32xbf16>, vector<16x32xbf16>, vector<4x16xf32> -> vector<4x16xf32>
    %58 = tpu.iota {dimensions = array<i32: 1>} : vector<4x16xi32>
    %c8_i32 = arith.constant 8 : i32
    %59 = vector.broadcast %c8_i32 : i32 to vector<4x16xi32>
    %60 = arith.cmpi sge, %58, %59 : vector<4x16xi32>
    %c8_i32_40 = arith.constant 8 : i32
    %c0_i32_41 = arith.constant 0 : i32
    %61 = vector.broadcast %c8_i32_40 : i32 to vector<4x16xi32>
    %62 = vector.broadcast %c0_i32_41 : i32 to vector<4x16xi32>
    %63 = arith.select %60, %61, %62 : vector<4x16xi1>, vector<4x16xi32>
    %64 = arith.subi %58, %63 : vector<4x16xi32>
    %65 = vector.broadcast %43 : i32 to vector<4x16xi32>
    %66 = arith.cmpi sge, %64, %65 : vector<4x16xi32>
    %cst_42 = arith.constant -1.000000e+02 : f32
    %67 = vector.broadcast %cst_42 : f32 to vector<4x16xf32>
    %68 = arith.select %66, %67, %57 : vector<4x16xi1>, vector<4x16xf32>
    %69 = vector.extract_strided_slice %68 {offsets = [0, 0], sizes = [4, 8], strides = [1, 1]} : vector<4x16xf32> to vector<4x8xf32>
    %cst_43 = arith.constant dense<0xFF800000> : vector<4xf32>
    %70 = vector.multi_reduction <maximumf>, %69, %cst_43 [1] : vector<4x8xf32> to vector<4xf32>
    %71 = vector.shape_cast %70 : vector<4xf32> to vector<4x1xf32>
    %72 = vector.broadcast %71 : vector<4x1xf32> to vector<4x8xf32>
    %73 = arith.subf %69, %72 : vector<4x8xf32>
    %74 = math.exp %73 : vector<4x8xf32>
    %cst_44 = arith.constant dense<0.000000e+00> : vector<4xf32>
    %75 = vector.multi_reduction <add>, %74, %cst_44 [1] : vector<4x8xf32> to vector<4xf32>
    %76 = vector.shape_cast %75 : vector<4xf32> to vector<4x1xf32>
    %77 = tpu.reciprocal %76 {approx = true} : vector<4x1xf32> -> vector<4x1xf32>
    %78 = vector.broadcast %77 : vector<4x1xf32> to vector<4x8xf32>
    %79 = arith.mulf %74, %78 : vector<4x8xf32>
    %80 = tpu.iota {dimensions = array<i32: 0>} : vector<4x8xi32>
    %81 = vector.broadcast %49 : i32 to vector<4x8xi32>
    %82 = arith.cmpi sge, %80, %81 : vector<4x8xi32>
    %cst_45 = arith.constant 0.000000e+00 : f32
    %83 = vector.broadcast %cst_45 : f32 to vector<4x8xf32>
    %84 = arith.select %82, %83, %79 : vector<4x8xi1>, vector<4x8xf32>
    %cst_46 = arith.constant dense<0.000000e+00> : vector<8xf32>
    %85 = vector.multi_reduction <add>, %84, %cst_46 [0] : vector<4x8xf32> to vector<8xf32>
    %86 = vector.shape_cast %85 : vector<8xf32> to vector<1x8xf32>
    %87 = vector.extract_strided_slice %68 {offsets = [0, 8], sizes = [4, 8], strides = [1, 1]} : vector<4x16xf32> to vector<4x8xf32>
    %cst_47 = arith.constant dense<0xFF800000> : vector<4xf32>
    %88 = vector.multi_reduction <maximumf>, %87, %cst_47 [1] : vector<4x8xf32> to vector<4xf32>
    %89 = vector.shape_cast %88 : vector<4xf32> to vector<4x1xf32>
    %90 = vector.broadcast %89 : vector<4x1xf32> to vector<4x8xf32>
    %91 = arith.subf %87, %90 : vector<4x8xf32>
    %92 = math.exp %91 : vector<4x8xf32>
    %cst_48 = arith.constant dense<0.000000e+00> : vector<4xf32>
    %93 = vector.multi_reduction <add>, %92, %cst_48 [1] : vector<4x8xf32> to vector<4xf32>
    %94 = vector.shape_cast %93 : vector<4xf32> to vector<4x1xf32>
    %95 = tpu.reciprocal %94 {approx = true} : vector<4x1xf32> -> vector<4x1xf32>
    %96 = vector.broadcast %95 : vector<4x1xf32> to vector<4x8xf32>
    %97 = arith.mulf %92, %96 : vector<4x8xf32>
    %98 = tpu.iota {dimensions = array<i32: 0>} : vector<4x8xi32>
    %99 = vector.broadcast %49 : i32 to vector<4x8xi32>
    %100 = arith.cmpi sge, %98, %99 : vector<4x8xi32>
    %cst_49 = arith.constant 0.000000e+00 : f32
    %101 = vector.broadcast %cst_49 : f32 to vector<4x8xf32>
    %102 = arith.select %100, %101, %97 : vector<4x8xi1>, vector<4x8xf32>
    %cst_50 = arith.constant dense<0.000000e+00> : vector<8xf32>
    %103 = vector.multi_reduction <add>, %102, %cst_50 [0] : vector<4x8xf32> to vector<8xf32>
    %104 = vector.shape_cast %103 : vector<8xf32> to vector<1x8xf32>
    %105 = vector.extract_strided_slice %13 {offsets = [0, 64], sizes = [8, 32], strides = [1, 1]} : vector<8x192xbf16> to vector<8x32xbf16>
    %106 = vector.extract_strided_slice %13 {offsets = [0, 96], sizes = [8, 32], strides = [1, 1]} : vector<8x192xbf16> to vector<8x32xbf16>
    %107 = tpu.concatenate %105, %106 in 0 : vector<8x32xbf16>, vector<8x32xbf16> -> vector<16x32xbf16>
    %cst_51 = arith.constant dense<0.000000e+00> : vector<7x16xf32>
    %108 = tpu.matmul %53, %107, %cst_51 {dimension_numbers = #tpu.dot_dimension_numbers<[1], [1], [0], [0], [0, 0, 1, 0], [], []>} : vector<7x32xbf16>, vector<16x32xbf16>, vector<7x16xf32> -> vector<7x16xf32>
    %109 = tpu.iota {dimensions = array<i32: 1>} : vector<7x16xi32>
    %c8_i32_52 = arith.constant 8 : i32
    %110 = vector.broadcast %c8_i32_52 : i32 to vector<7x16xi32>
    %111 = arith.cmpi sge, %109, %110 : vector<7x16xi32>
    %c8_i32_53 = arith.constant 8 : i32
    %c0_i32_54 = arith.constant 0 : i32
    %112 = vector.broadcast %c8_i32_53 : i32 to vector<7x16xi32>
    %113 = vector.broadcast %c0_i32_54 : i32 to vector<7x16xi32>
    %114 = arith.select %111, %112, %113 : vector<7x16xi1>, vector<7x16xi32>
    %115 = arith.subi %109, %114 : vector<7x16xi32>
    %116 = vector.broadcast %43 : i32 to vector<7x16xi32>
    %117 = arith.cmpi sge, %115, %116 : vector<7x16xi32>
    %cst_55 = arith.constant -1.000000e+02 : f32
    %118 = vector.broadcast %cst_55 : f32 to vector<7x16xf32>
    %119 = arith.select %117, %118, %108 : vector<7x16xi1>, vector<7x16xf32>
    %120 = vector.extract_strided_slice %119 {offsets = [0, 0], sizes = [7, 8], strides = [1, 1]} : vector<7x16xf32> to vector<7x8xf32>
    %cst_56 = arith.constant dense<0xFF800000> : vector<7xf32>
    %121 = vector.multi_reduction <maximumf>, %120, %cst_56 [1] : vector<7x8xf32> to vector<7xf32>
    %122 = vector.shape_cast %121 : vector<7xf32> to vector<7x1xf32>
    %123 = vector.broadcast %122 : vector<7x1xf32> to vector<7x8xf32>
    %124 = arith.subf %120, %123 : vector<7x8xf32>
    %125 = math.exp %124 : vector<7x8xf32>
    %cst_57 = arith.constant dense<0.000000e+00> : vector<7xf32>
    %126 = vector.multi_reduction <add>, %125, %cst_57 [1] : vector<7x8xf32> to vector<7xf32>
    %127 = vector.shape_cast %126 : vector<7xf32> to vector<7x1xf32>
    %128 = tpu.reciprocal %127 {approx = true} : vector<7x1xf32> -> vector<7x1xf32>
    %129 = vector.broadcast %128 : vector<7x1xf32> to vector<7x8xf32>
    %130 = arith.mulf %125, %129 : vector<7x8xf32>
    %131 = tpu.iota {dimensions = array<i32: 0>} : vector<7x8xi32>
    %132 = vector.broadcast %47 : i32 to vector<7x8xi32>
    %133 = arith.cmpi sge, %131, %132 : vector<7x8xi32>
    %cst_58 = arith.constant 0.000000e+00 : f32
    %134 = vector.broadcast %cst_58 : f32 to vector<7x8xf32>
    %135 = arith.select %133, %134, %130 : vector<7x8xi1>, vector<7x8xf32>
    %cst_59 = arith.constant dense<0.000000e+00> : vector<8xf32>
    %136 = vector.multi_reduction <add>, %135, %cst_59 [0] : vector<7x8xf32> to vector<8xf32>
    %137 = vector.shape_cast %136 : vector<8xf32> to vector<1x8xf32>
    %138 = vector.extract_strided_slice %119 {offsets = [0, 8], sizes = [7, 8], strides = [1, 1]} : vector<7x16xf32> to vector<7x8xf32>
    %cst_60 = arith.constant dense<0xFF800000> : vector<7xf32>
    %139 = vector.multi_reduction <maximumf>, %138, %cst_60 [1] : vector<7x8xf32> to vector<7xf32>
    %140 = vector.shape_cast %139 : vector<7xf32> to vector<7x1xf32>
    %141 = vector.broadcast %140 : vector<7x1xf32> to vector<7x8xf32>
    %142 = arith.subf %138, %141 : vector<7x8xf32>
    %143 = math.exp %142 : vector<7x8xf32>
    %cst_61 = arith.constant dense<0.000000e+00> : vector<7xf32>
    %144 = vector.multi_reduction <add>, %143, %cst_61 [1] : vector<7x8xf32> to vector<7xf32>
    %145 = vector.shape_cast %144 : vector<7xf32> to vector<7x1xf32>
    %146 = tpu.reciprocal %145 {approx = true} : vector<7x1xf32> -> vector<7x1xf32>
    %147 = vector.broadcast %146 : vector<7x1xf32> to vector<7x8xf32>
    %148 = arith.mulf %143, %147 : vector<7x8xf32>
    %149 = tpu.iota {dimensions = array<i32: 0>} : vector<7x8xi32>
    %150 = vector.broadcast %47 : i32 to vector<7x8xi32>
    %151 = arith.cmpi sge, %149, %150 : vector<7x8xi32>
    %cst_62 = arith.constant 0.000000e+00 : f32
    %152 = vector.broadcast %cst_62 : f32 to vector<7x8xf32>
    %153 = arith.select %151, %152, %148 : vector<7x8xi1>, vector<7x8xf32>
    %cst_63 = arith.constant dense<0.000000e+00> : vector<8xf32>
    %154 = vector.multi_reduction <add>, %153, %cst_63 [0] : vector<7x8xf32> to vector<8xf32>
    %155 = vector.shape_cast %154 : vector<8xf32> to vector<1x8xf32>
    %156 = tpu.concatenate %86, %104, %137, %155 in 0 : vector<1x8xf32>, vector<1x8xf32>, vector<1x8xf32>, vector<1x8xf32> -> vector<4x8xf32>
    %157 = arith.truncf %156 : vector<4x8xf32> to vector<4x8xbf16>
    %158 = vector.extract_strided_slice %13 {offsets = [0, 128], sizes = [8, 64], strides = [1, 1]} : vector<8x192xbf16> to vector<8x64xbf16>
    %cst_64 = arith.constant dense<0.000000e+00> : vector<4x64xf32>
    %159 = tpu.matmul %157, %158, %cst_64 {dimension_numbers = #tpu.dot_dimension_numbers<[1], [0], [0], [1], [0, 0, 1, 1], [], []>} : vector<4x8xbf16>, vector<8x64xbf16>, vector<4x64xf32> -> vector<4x64xf32>
    %160 = vector.extract_strided_slice %159 {offsets = [0, 0], sizes = [1, 32], strides = [1, 1]} : vector<4x64xf32> to vector<1x32xf32>
    %161 = vector.extract_strided_slice %159 {offsets = [2, 32], sizes = [1, 32], strides = [1, 1]} : vector<4x64xf32> to vector<1x32xf32>
    %162 = arith.addf %160, %161 : vector<1x32xf32>
    %163 = vector.extract_strided_slice %159 {offsets = [1, 0], sizes = [1, 32], strides = [1, 1]} : vector<4x64xf32> to vector<1x32xf32>
    %164 = vector.extract_strided_slice %159 {offsets = [3, 32], sizes = [1, 32], strides = [1, 1]} : vector<4x64xf32> to vector<1x32xf32>
    %165 = arith.addf %163, %164 : vector<1x32xf32>
    %166 = vector.extract_strided_slice %19 {offsets = [0, 0], sizes = [5, 32], strides = [1, 1]} : vector<5x192xbf16> to vector<5x32xbf16>
    %167 = vector.extract_strided_slice %19 {offsets = [0, 32], sizes = [5, 32], strides = [1, 1]} : vector<5x192xbf16> to vector<5x32xbf16>
    %168 = tpu.concatenate %166, %167 in 0 : vector<5x32xbf16>, vector<5x32xbf16> -> vector<10x32xbf16>
    %cst_65 = arith.constant dense<0.000000e+00> : vector<4x10xf32>
    %169 = tpu.matmul %51, %168, %cst_65 {dimension_numbers = #tpu.dot_dimension_numbers<[1], [1], [0], [0], [0, 0, 1, 0], [], []>} : vector<4x32xbf16>, vector<10x32xbf16>, vector<4x10xf32> -> vector<4x10xf32>
    %170 = tpu.iota {dimensions = array<i32: 1>} : vector<4x10xi32>
    %c5_i32 = arith.constant 5 : i32
    %171 = vector.broadcast %c5_i32 : i32 to vector<4x10xi32>
    %172 = arith.cmpi sge, %170, %171 : vector<4x10xi32>
    %c5_i32_66 = arith.constant 5 : i32
    %c0_i32_67 = arith.constant 0 : i32
    %173 = vector.broadcast %c5_i32_66 : i32 to vector<4x10xi32>
    %174 = vector.broadcast %c0_i32_67 : i32 to vector<4x10xi32>
    %175 = arith.select %172, %173, %174 : vector<4x10xi1>, vector<4x10xi32>
    %176 = arith.subi %170, %175 : vector<4x10xi32>
    %177 = vector.broadcast %45 : i32 to vector<4x10xi32>
    %178 = arith.cmpi sge, %176, %177 : vector<4x10xi32>
    %cst_68 = arith.constant -1.000000e+02 : f32
    %179 = vector.broadcast %cst_68 : f32 to vector<4x10xf32>
    %180 = arith.select %178, %179, %169 : vector<4x10xi1>, vector<4x10xf32>
    %181 = vector.extract_strided_slice %180 {offsets = [0, 0], sizes = [4, 5], strides = [1, 1]} : vector<4x10xf32> to vector<4x5xf32>
    %cst_69 = arith.constant dense<0xFF800000> : vector<4xf32>
    %182 = vector.multi_reduction <maximumf>, %181, %cst_69 [1] : vector<4x5xf32> to vector<4xf32>
    %183 = vector.shape_cast %182 : vector<4xf32> to vector<4x1xf32>
    %184 = vector.broadcast %183 : vector<4x1xf32> to vector<4x5xf32>
    %185 = arith.subf %181, %184 : vector<4x5xf32>
    %186 = math.exp %185 : vector<4x5xf32>
    %cst_70 = arith.constant dense<0.000000e+00> : vector<4xf32>
    %187 = vector.multi_reduction <add>, %186, %cst_70 [1] : vector<4x5xf32> to vector<4xf32>
    %188 = vector.shape_cast %187 : vector<4xf32> to vector<4x1xf32>
    %189 = tpu.reciprocal %188 {approx = true} : vector<4x1xf32> -> vector<4x1xf32>
    %190 = vector.broadcast %189 : vector<4x1xf32> to vector<4x5xf32>
    %191 = arith.mulf %186, %190 : vector<4x5xf32>
    %192 = tpu.iota {dimensions = array<i32: 0>} : vector<4x5xi32>
    %193 = vector.broadcast %49 : i32 to vector<4x5xi32>
    %194 = arith.cmpi sge, %192, %193 : vector<4x5xi32>
    %cst_71 = arith.constant 0.000000e+00 : f32
    %195 = vector.broadcast %cst_71 : f32 to vector<4x5xf32>
    %196 = arith.select %194, %195, %191 : vector<4x5xi1>, vector<4x5xf32>
    %cst_72 = arith.constant dense<0.000000e+00> : vector<5xf32>
    %197 = vector.multi_reduction <add>, %196, %cst_72 [0] : vector<4x5xf32> to vector<5xf32>
    %198 = vector.shape_cast %197 : vector<5xf32> to vector<1x5xf32>
    %199 = vector.extract_strided_slice %180 {offsets = [0, 5], sizes = [4, 5], strides = [1, 1]} : vector<4x10xf32> to vector<4x5xf32>
    %cst_73 = arith.constant dense<0xFF800000> : vector<4xf32>
    %200 = vector.multi_reduction <maximumf>, %199, %cst_73 [1] : vector<4x5xf32> to vector<4xf32>
    %201 = vector.shape_cast %200 : vector<4xf32> to vector<4x1xf32>
    %202 = vector.broadcast %201 : vector<4x1xf32> to vector<4x5xf32>
    %203 = arith.subf %199, %202 : vector<4x5xf32>
    %204 = math.exp %203 : vector<4x5xf32>
    %cst_74 = arith.constant dense<0.000000e+00> : vector<4xf32>
    %205 = vector.multi_reduction <add>, %204, %cst_74 [1] : vector<4x5xf32> to vector<4xf32>
    %206 = vector.shape_cast %205 : vector<4xf32> to vector<4x1xf32>
    %207 = tpu.reciprocal %206 {approx = true} : vector<4x1xf32> -> vector<4x1xf32>
    %208 = vector.broadcast %207 : vector<4x1xf32> to vector<4x5xf32>
    %209 = arith.mulf %204, %208 : vector<4x5xf32>
    %210 = tpu.iota {dimensions = array<i32: 0>} : vector<4x5xi32>
    %211 = vector.broadcast %49 : i32 to vector<4x5xi32>
    %212 = arith.cmpi sge, %210, %211 : vector<4x5xi32>
    %cst_75 = arith.constant 0.000000e+00 : f32
    %213 = vector.broadcast %cst_75 : f32 to vector<4x5xf32>
    %214 = arith.select %212, %213, %209 : vector<4x5xi1>, vector<4x5xf32>
    %cst_76 = arith.constant dense<0.000000e+00> : vector<5xf32>
    %215 = vector.multi_reduction <add>, %214, %cst_76 [0] : vector<4x5xf32> to vector<5xf32>
    %216 = vector.shape_cast %215 : vector<5xf32> to vector<1x5xf32>
    %217 = vector.extract_strided_slice %19 {offsets = [0, 64], sizes = [5, 32], strides = [1, 1]} : vector<5x192xbf16> to vector<5x32xbf16>
    %218 = vector.extract_strided_slice %19 {offsets = [0, 96], sizes = [5, 32], strides = [1, 1]} : vector<5x192xbf16> to vector<5x32xbf16>
    %219 = tpu.concatenate %217, %218 in 0 : vector<5x32xbf16>, vector<5x32xbf16> -> vector<10x32xbf16>
    %cst_77 = arith.constant dense<0.000000e+00> : vector<7x10xf32>
    %220 = tpu.matmul %53, %219, %cst_77 {dimension_numbers = #tpu.dot_dimension_numbers<[1], [1], [0], [0], [0, 0, 1, 0], [], []>} : vector<7x32xbf16>, vector<10x32xbf16>, vector<7x10xf32> -> vector<7x10xf32>
    %221 = tpu.iota {dimensions = array<i32: 1>} : vector<7x10xi32>
    %c5_i32_78 = arith.constant 5 : i32
    %222 = vector.broadcast %c5_i32_78 : i32 to vector<7x10xi32>
    %223 = arith.cmpi sge, %221, %222 : vector<7x10xi32>
    %c5_i32_79 = arith.constant 5 : i32
    %c0_i32_80 = arith.constant 0 : i32
    %224 = vector.broadcast %c5_i32_79 : i32 to vector<7x10xi32>
    %225 = vector.broadcast %c0_i32_80 : i32 to vector<7x10xi32>
    %226 = arith.select %223, %224, %225 : vector<7x10xi1>, vector<7x10xi32>
    %227 = arith.subi %221, %226 : vector<7x10xi32>
    %228 = vector.broadcast %45 : i32 to vector<7x10xi32>
    %229 = arith.cmpi sge, %227, %228 : vector<7x10xi32>
    %cst_81 = arith.constant -1.000000e+02 : f32
    %230 = vector.broadcast %cst_81 : f32 to vector<7x10xf32>
    %231 = arith.select %229, %230, %220 : vector<7x10xi1>, vector<7x10xf32>
    %232 = vector.extract_strided_slice %231 {offsets = [0, 0], sizes = [7, 5], strides = [1, 1]} : vector<7x10xf32> to vector<7x5xf32>
    %cst_82 = arith.constant dense<0xFF800000> : vector<7xf32>
    %233 = vector.multi_reduction <maximumf>, %232, %cst_82 [1] : vector<7x5xf32> to vector<7xf32>
    %234 = vector.shape_cast %233 : vector<7xf32> to vector<7x1xf32>
    %235 = vector.broadcast %234 : vector<7x1xf32> to vector<7x5xf32>
    %236 = arith.subf %232, %235 : vector<7x5xf32>
    %237 = math.exp %236 : vector<7x5xf32>
    %cst_83 = arith.constant dense<0.000000e+00> : vector<7xf32>
    %238 = vector.multi_reduction <add>, %237, %cst_83 [1] : vector<7x5xf32> to vector<7xf32>
    %239 = vector.shape_cast %238 : vector<7xf32> to vector<7x1xf32>
    %240 = tpu.reciprocal %239 {approx = true} : vector<7x1xf32> -> vector<7x1xf32>
    %241 = vector.broadcast %240 : vector<7x1xf32> to vector<7x5xf32>
    %242 = arith.mulf %237, %241 : vector<7x5xf32>
    %243 = tpu.iota {dimensions = array<i32: 0>} : vector<7x5xi32>
    %244 = vector.broadcast %47 : i32 to vector<7x5xi32>
    %245 = arith.cmpi sge, %243, %244 : vector<7x5xi32>
    %cst_84 = arith.constant 0.000000e+00 : f32
    %246 = vector.broadcast %cst_84 : f32 to vector<7x5xf32>
    %247 = arith.select %245, %246, %242 : vector<7x5xi1>, vector<7x5xf32>
    %cst_85 = arith.constant dense<0.000000e+00> : vector<5xf32>
    %248 = vector.multi_reduction <add>, %247, %cst_85 [0] : vector<7x5xf32> to vector<5xf32>
    %249 = vector.shape_cast %248 : vector<5xf32> to vector<1x5xf32>
    %250 = vector.extract_strided_slice %231 {offsets = [0, 5], sizes = [7, 5], strides = [1, 1]} : vector<7x10xf32> to vector<7x5xf32>
    %cst_86 = arith.constant dense<0xFF800000> : vector<7xf32>
    %251 = vector.multi_reduction <maximumf>, %250, %cst_86 [1] : vector<7x5xf32> to vector<7xf32>
    %252 = vector.shape_cast %251 : vector<7xf32> to vector<7x1xf32>
    %253 = vector.broadcast %252 : vector<7x1xf32> to vector<7x5xf32>
    %254 = arith.subf %250, %253 : vector<7x5xf32>
    %255 = math.exp %254 : vector<7x5xf32>
    %cst_87 = arith.constant dense<0.000000e+00> : vector<7xf32>
    %256 = vector.multi_reduction <add>, %255, %cst_87 [1] : vector<7x5xf32> to vector<7xf32>
    %257 = vector.shape_cast %256 : vector<7xf32> to vector<7x1xf32>
    %258 = tpu.reciprocal %257 {approx = true} : vector<7x1xf32> -> vector<7x1xf32>
    %259 = vector.broadcast %258 : vector<7x1xf32> to vector<7x5xf32>
    %260 = arith.mulf %255, %259 : vector<7x5xf32>
    %261 = tpu.iota {dimensions = array<i32: 0>} : vector<7x5xi32>
    %262 = vector.broadcast %47 : i32 to vector<7x5xi32>
    %263 = arith.cmpi sge, %261, %262 : vector<7x5xi32>
    %cst_88 = arith.constant 0.000000e+00 : f32
    %264 = vector.broadcast %cst_88 : f32 to vector<7x5xf32>
    %265 = arith.select %263, %264, %260 : vector<7x5xi1>, vector<7x5xf32>
    %cst_89 = arith.constant dense<0.000000e+00> : vector<5xf32>
    %266 = vector.multi_reduction <add>, %265, %cst_89 [0] : vector<7x5xf32> to vector<5xf32>
    %267 = vector.shape_cast %266 : vector<5xf32> to vector<1x5xf32>
    %268 = tpu.concatenate %198, %216, %249, %267 in 0 : vector<1x5xf32>, vector<1x5xf32>, vector<1x5xf32>, vector<1x5xf32> -> vector<4x5xf32>
    %269 = arith.truncf %268 : vector<4x5xf32> to vector<4x5xbf16>
    %270 = vector.extract_strided_slice %19 {offsets = [0, 128], sizes = [5, 64], strides = [1, 1]} : vector<5x192xbf16> to vector<5x64xbf16>
    %cst_90 = arith.constant dense<0.000000e+00> : vector<4x64xf32>
    %271 = tpu.matmul %269, %270, %cst_90 {dimension_numbers = #tpu.dot_dimension_numbers<[1], [0], [0], [1], [0, 0, 1, 1], [], []>} : vector<4x5xbf16>, vector<5x64xbf16>, vector<4x64xf32> -> vector<4x64xf32>
    %272 = vector.extract_strided_slice %271 {offsets = [0, 0], sizes = [1, 32], strides = [1, 1]} : vector<4x64xf32> to vector<1x32xf32>
    %273 = vector.extract_strided_slice %271 {offsets = [2, 32], sizes = [1, 32], strides = [1, 1]} : vector<4x64xf32> to vector<1x32xf32>
    %274 = arith.addf %272, %273 : vector<1x32xf32>
    %275 = vector.extract_strided_slice %271 {offsets = [1, 0], sizes = [1, 32], strides = [1, 1]} : vector<4x64xf32> to vector<1x32xf32>
    %276 = vector.extract_strided_slice %271 {offsets = [3, 32], sizes = [1, 32], strides = [1, 1]} : vector<4x64xf32> to vector<1x32xf32>
    %277 = arith.addf %275, %276 : vector<1x32xf32>
    %278 = arith.addf %162, %274 : vector<1x32xf32>
    %279 = arith.addf %278, %25 : vector<1x32xf32>
    %280 = arith.addf %165, %277 : vector<1x32xf32>
    %281 = arith.addf %280, %25 : vector<1x32xf32>
    %282 = arith.truncf %281 : vector<1x32xf32> to vector<1x32xbf16>
    %cst_91 = arith.constant dense<0.000000e+00> : vector<1x4xf32>
    %283 = tpu.matmul %282, %39, %cst_91 {dimension_numbers = #tpu.dot_dimension_numbers<[1], [1], [0], [0], [0, 0, 1, 0], [], []>} : vector<1x32xbf16>, vector<4x32xbf16>, vector<1x4xf32> -> vector<1x4xf32>
    %284 = tpu.iota {dimensions = array<i32: 1>} : vector<1x4xi32>
    %285 = vector.broadcast %49 : i32 to vector<1x4xi32>
    %286 = arith.cmpi sge, %284, %285 : vector<1x4xi32>
    %cst_92 = arith.constant -1.000000e+02 : f32
    %287 = vector.broadcast %cst_92 : f32 to vector<1x4xf32>
    %288 = arith.select %286, %287, %283 : vector<1x4xi1>, vector<1x4xf32>
    %289 = math.tanh %279 : vector<1x32xf32>
    %290 = arith.truncf %289 : vector<1x32xf32> to vector<1x32xbf16>
    %c0_93 = arith.constant 0 : index
    %c0_94 = arith.constant 0 : index
    %291 = vector.load %arg13[%c0_93, %c0_94] : memref<32x128xbf16, #tpu.memory_space<vmem>>, vector<32x128xbf16>
    %cst_95 = arith.constant dense<0.000000e+00> : vector<1x128xf32>
    %292 = tpu.matmul %290, %291, %cst_95 {dimension_numbers = #tpu.dot_dimension_numbers<[1], [0], [0], [1], [0, 0, 1, 1], [], []>} : vector<1x32xbf16>, vector<32x128xbf16>, vector<1x128xf32> -> vector<1x128xf32>
    %c0_96 = arith.constant 0 : index
    %c0_97 = arith.constant 0 : index
    %293 = vector.load %arg14[%c0_96, %c0_97] : memref<1x128xf32, #tpu.memory_space<vmem>>, vector<1x128xf32>
    %294 = arith.addf %292, %293 : vector<1x128xf32>
    %295 = arith.truncf %288 : vector<1x4xf32> to vector<1x4xbf16>
    %c0_98 = arith.constant 0 : index
    %c0_99 = arith.constant 0 : index
    %296 = vector.load %arg17[%c0_98, %c0_99] : memref<4x128xbf16, #tpu.memory_space<vmem>>, vector<4x128xbf16>
    %cst_100 = arith.constant dense<0.000000e+00> : vector<1x128xf32>
    %297 = tpu.matmul %295, %296, %cst_100 {dimension_numbers = #tpu.dot_dimension_numbers<[1], [0], [0], [1], [0, 0, 1, 1], [], []>} : vector<1x4xbf16>, vector<4x128xbf16>, vector<1x128xf32> -> vector<1x128xf32>
    %298 = arith.addf %294, %297 : vector<1x128xf32>
    %299 = vector.shape_cast %298 : vector<1x128xf32> to vector<1x1x128xf32>
    %c0_101 = arith.constant 0 : index
    %c0_102 = arith.constant 0 : index
    %c0_103 = arith.constant 0 : index
    %300 = vector.load %arg18[%c0_101, %c0_102, %c0_103] : memref<1x1x128xf32, #tpu.memory_space<vmem>>, vector<1x1x128xf32>
    tpu.vector_store %arg18[%c0_101, %c0_102, %c0_103], %299 {strides = array<i32>} : memref<1x1x128xf32, #tpu.memory_space<vmem>>, vector<1x1x128xf32>,
    return
  }
  func.func @transform_0(%arg0: i32, %arg1: memref<2x4xi32, #tpu.memory_space<smem>>) -> (i32, i32, i32) {
    %c0_i32 = arith.constant 0 : i32
    %c0_i32_0 = arith.constant 0 : i32
    %c0_i32_1 = arith.constant 0 : i32
    return %arg0, %c0_i32, %c0_i32_0 : i32, i32, i32
  }
  func.func @transform_1(%arg0: i32, %arg1: memref<2x4xi32, #tpu.memory_space<smem>>) -> (i32, i32, i32) {
    %c0_i32 = arith.constant 0 : i32
    %c0_i32_0 = arith.constant 0 : i32
    %c0_i32_1 = arith.constant 0 : i32
    return %arg0, %c0_i32, %c0_i32_0 : i32, i32, i32
  }
  func.func @transform_2(%arg0: i32, %arg1: memref<2x4xi32, #tpu.memory_space<smem>>) -> (i32, i32, i32) {
    %c0_i32 = arith.constant 0 : i32
    %c0_i32_0 = arith.constant 0 : i32
    %c0_i32_1 = arith.constant 0 : i32
    return %arg0, %c0_i32, %c0_i32_0 : i32, i32, i32
  }
  func.func @transform_3(%arg0: i32, %arg1: memref<2x4xi32, #tpu.memory_space<smem>>) -> (i32, i32, i32) {
    %c0_i32 = arith.constant 0 : i32
    %c0_i32_0 = arith.constant 0 : i32
    %c0_i32_1 = arith.constant 0 : i32
    return %arg0, %c0_i32, %c0_i32_0 : i32, i32, i32
  }
  func.func @transform_4(%arg0: i32, %arg1: memref<2x4xi32, #tpu.memory_space<smem>>) -> (i32, i32, i32) {
    %c0_i32 = arith.constant 0 : i32
    %c0_i32_0 = arith.constant 0 : i32
    %c0_i32_1 = arith.constant 0 : i32
    return %arg0, %c0_i32, %c0_i32_0 : i32, i32, i32
  }
  func.func @transform_5(%arg0: i32, %arg1: memref<2x4xi32, #tpu.memory_space<smem>>) -> (i32, i32) {
    %c0_i32 = arith.constant 0 : i32
    %c0_i32_0 = arith.constant 0 : i32
    %c0_i32_1 = arith.constant 0 : i32
    return %c0_i32, %c0_i32_0 : i32, i32
  }
  func.func @transform_6(%arg0: i32, %arg1: memref<2x4xi32, #tpu.memory_space<smem>>) -> (i32, i32) {
    %c0_i32 = arith.constant 0 : i32
    %c0_i32_0 = arith.constant 0 : i32
    %c0_i32_1 = arith.constant 0 : i32
    return %c0_i32, %c0_i32_0 : i32, i32
  }
  func.func @transform_7(%arg0: i32, %arg1: memref<2x4xi32, #tpu.memory_space<smem>>) -> (i32, i32) {
    %c0_i32 = arith.constant 0 : i32
    %c0_i32_0 = arith.constant 0 : i32
    %c0_i32_1 = arith.constant 0 : i32
    return %c0_i32, %c0_i32_0 : i32, i32
  }
  func.func @transform_8(%arg0: i32, %arg1: memref<2x4xi32, #tpu.memory_space<smem>>) -> (i32, i32) {
    %c0_i32 = arith.constant 0 : i32
    %c0_i32_0 = arith.constant 0 : i32
    %c0_i32_1 = arith.constant 0 : i32
    return %c0_i32, %c0_i32_0 : i32, i32
  }
  func.func @transform_9(%arg0: i32, %arg1: memref<2x4xi32, #tpu.memory_space<smem>>) -> (i32, i32) {
    %c0_i32 = arith.constant 0 : i32
    %c0_i32_0 = arith.constant 0 : i32
    %c0_i32_1 = arith.constant 0 : i32
    return %c0_i32, %c0_i32_0 : i32, i32
  }
  func.func @transform_10(%arg0: i32, %arg1: memref<2x4xi32, #tpu.memory_space<smem>>) -> (i32, i32) {
    %c0_i32 = arith.constant 0 : i32
    %c0_i32_0 = arith.constant 0 : i32
    %c0_i32_1 = arith.constant 0 : i32
    return %c0_i32, %c0_i32_0 : i32, i32
  }
  func.func @transform_11(%arg0: i32, %arg1: memref<2x4xi32, #tpu.memory_space<smem>>) -> (i32, i32) {
    %c0_i32 = arith.constant 0 : i32
    %c0_i32_0 = arith.constant 0 : i32
    %c0_i32_1 = arith.constant 0 : i32
    return %c0_i32, %c0_i32_0 : i32, i32
  }
  func.func @transform_12(%arg0: i32, %arg1: memref<2x4xi32, #tpu.memory_space<smem>>) -> (i32, i32) {
    %c0_i32 = arith.constant 0 : i32
    %c0_i32_0 = arith.constant 0 : i32
    %c0_i32_1 = arith.constant 0 : i32
    return %c0_i32, %c0_i32_0 : i32, i32
  }
  func.func @transform_13(%arg0: i32, %arg1: memref<2x4xi32, #tpu.memory_space<smem>>) -> (i32, i32) {
    %c0_i32 = arith.constant 0 : i32
    %c0_i32_0 = arith.constant 0 : i32
    %c0_i32_1 = arith.constant 0 : i32
    return %c0_i32, %c0_i32_0 : i32, i32
  }
  func.func @transform_14(%arg0: i32, %arg1: memref<2x4xi32, #tpu.memory_space<smem>>) -> (i32, i32) {
    %c0_i32 = arith.constant 0 : i32
    %c0_i32_0 = arith.constant 0 : i32
    %c0_i32_1 = arith.constant 0 : i32
    return %c0_i32, %c0_i32_0 : i32, i32
  }
  func.func @transform_15(%arg0: i32, %arg1: memref<2x4xi32, #tpu.memory_space<smem>>) -> (i32, i32) {
    %c0_i32 = arith.constant 0 : i32
    %c0_i32_0 = arith.constant 0 : i32
    %c0_i32_1 = arith.constant 0 : i32
    return %c0_i32, %c0_i32_0 : i32, i32
  }
  func.func @transform_16(%arg0: i32, %arg1: memref<2x4xi32, #tpu.memory_space<smem>>) -> (i32, i32, i32) {
    %c0_i32 = arith.constant 0 : i32
    %c0_i32_0 = arith.constant 0 : i32
    %c0_i32_1 = arith.constant 0 : i32
    return %arg0, %c0_i32, %c0_i32_0 : i32, i32, i32
  }
}

</mosaic_0001>

<bundles_post_ra>
// kernel: custom-call.8
= control target key start
LH: loop header
LB: loop body
LE: loop exit
PB: predicated region body
PF: predicated region fallthrough
CT: control target
= control target key end

     0   :  { %s6_s0 = inlined_call_operand.vmem [shape: bf16[5,2,32], index: 0, kind: output, shape index: {}]  }

// kernel: custom-call.5
= control target key start
LH: loop header
LB: loop body
LE: loop exit
PB: predicated region body
PF: predicated region fallthrough
CT: control target
= control target key end

     0   :  { %s6_s0 = inlined_call_operand.vmem [shape: f32[2,32], index: 0, kind: output, shape index: {}]  }

// kernel: custom-call.4
= control target key start
LH: loop header
LB: loop body
LE: loop exit
PB: predicated region body
PF: predicated region fallthrough
CT: control target
= control target key end

     0   :  { %s6_s0 = inlined_call_operand.vmem [shape: bf16[2,32], index: 0, kind: output, shape index: {}]  }

// kernel: custom-call.9
= control target key start
LH: loop header
LB: loop body
LE: loop exit
PB: predicated region body
PF: predicated region fallthrough
CT: control target
= control target key end

     0   :  { %s6_s0 = inlined_call_operand.vmem [shape: bf16[5,2,32], index: 0, kind: output, shape index: {}]  }

// kernel: from_predictor_forward.1
= control target key start
LH: loop header
LB: loop body
LE: loop exit
PB: predicated region body
PF: predicated region fallthrough
CT: control target
= control target key end

     0   :  { %s1572_s27 = smov [#allocation3]   ;;  %s1987_s0 = inlined_call_operand.vmem [shape: s32[2,4], index: 0, kind: input, shape index: {}]   ;;  %s1988_s1 = inlined_call_operand.vmem [shape: bf16[2,8,32], index: 1, kind: input, shape index: {}]   ;;  %s1989_s2 = inlined_call_operand.vmem [shape: bf16[2,5,32], index: 2, kind: input, shape index: {}]   ;;  %s1990_s3 = inlined_call_operand.vmem [shape: bf16[2,4,32], index: 3, kind: input, shape index: {}]   ;;  %s1991_s4 = inlined_call_operand.vmem [shape: bf16[2,7,32], index: 4, kind: input, shape index: {}]   ;;  %s1992_s5 = inlined_call_operand.vmem [shape: bf16[2,1,32], index: 5, kind: input, shape index: {}]   ;;  %s1993_s6 = inlined_call_operand.vmem [shape: bf16[32,192], index: 6, kind: input, shape index: {}]   ;;  %s1994_s7 = inlined_call_operand.vmem [shape: f32[1,192], index: 7, kind: input, shape index: {}]   ;;  %s1995_s8 = inlined_call_operand.vmem [shape: bf16[32,192], index: 8, kind: input, shape index: {}]   ;;  %s1996_s9 = inlined_call_operand.vmem [shape: f32[1,192], index: 9, kind: input, shape index: {}]   ;;  %s1997_s10 = inlined_call_operand.vmem [shape: bf16[32,32], index: 10, kind: input, shape index: {}]   ;;  %s1998_s11 = inlined_call_operand.vmem [shape: f32[1,32], index: 11, kind: input, shape index: {}]   ;;  %s1999_s12 = inlined_call_operand.vmem [shape: bf16[32,128], index: 12, kind: input, shape index: {}]   ;;  %s2000_s13 = inlined_call_operand.vmem [shape: f32[1,128], index: 13, kind: input, shape index: {}]   ;;  %s2001_s14 = inlined_call_operand.vmem [shape: bf16[32,32], index: 14, kind: input, shape index: {}]   ;;  %s2002_s15 = inlined_call_operand.vmem [shape: f32[1,32], index: 15, kind: input, shape index: {}]   ;;  %s2003_s16 = inlined_call_operand.vmem [shape: bf16[4,128], index: 16, kind: input, shape index: {}]   ;;  %s2004_s17 = inlined_call_operand.vmem [shape: f32[2,1,128], index: 17, kind: output, shape index: {}]  }
   0x1   :  { %2005 = sst [smem:[#allocation5_spill]] %s1987_s0 }
   0x2   :  { %2006 = sst [smem:[#allocation6_spill]] %s1988_s1 }
   0x3   :  { %2007 = sst [smem:[#allocation7_spill]] %s1998_s11 }
   0x4   :  { %s2008_s26 = sld [smem:[#allocation5_spill]] }
   0xa   :  { %s23_s11 = sshll.u32 %s2008_s26, 4  ;;  %s24_s11 = int_to_ptr.vmem [resolvable:$true] %s23_s11 }
   0xb   :  { %26 = dma.vmem_to_smem %s24_s11, 32, %s1572_s27, [#allocation2] }
   0xc   :  { %1566 = dma.done.wait [#allocation2], 32 }
   0xd   :  { %1567 = vsyncadd [#allocation2], 4294967264 }
   0xe   :  { %29 = sfence }
   0xf   :  { %s1672_s28 = smov 0  }
  0x10 LB: > { %s1678_s29 = sadd.s32 4294967295, %s1570_s28   ;;  %p1390_p0 = scmp.ge.s32.totalorder %s1570_s28, 1  ;;  %s1570_s28 = sphi %s1672_s28, %s35_s28  }
  0x11   : > { %p505_p1 = scmp.lt.s32.totalorder %s1570_s28, 3 }
  0x13   : > { %p506_p2 = pnand %p1390_p0, %p505_p1 }
  0x14   : > { %p567_p3 = scmp.lt.s32.totalorder (!%p506_p2), %s1678_s29, 1  ;;  %s2009_s26 = sld [smem:[#allocation6_spill]] (!%p506_p2) }
  0x15   : > { %509 = sbr.rel (%p506_p2) target bundleno = 1566 (0x61e), region = 84  ;;  %s1574_s20 = smov (!%p506_p2), 64  }
  0x16   : > { %s1787_s21 = sshll.u32 (!%p506_p2), %s1678_s29, 7 }
  0x17   : > { %s816_s24 = sadd.s32 (!%p506_p2), 3, %s1787_s21 }
  0x1a   : > { %v1423_v0 = vld [vmem:[%s1995_s8 + $0x10] sm:$0xf]  ;;  %v1477_v1 = vld [vmem:[%s1995_s8 + $0x14] sm:$0xf0]  ;;  %v1476_v2 = vld [vmem:[%s1995_s8 + $0x14] sm:$0xf] }
  0x1b   : > { %v1424_v3 = vor.u32 %v1477_v1, %v1423_v0  ;;  %v1425_v4 = vld [vmem:[%s1995_s8 + $0x18] sm:$0xf0]  ;;  %v1415_v5 = vld [vmem:[%s1995_s8] sm:$0xf]  ;;  %v1475_v6 = vld [vmem:[%s1995_s8 + $0x4] sm:$0xf0] }
  0x1c   : > { %v1428_v7 = vor.u32 %v1476_v2, %v1425_v4  ;;  %v1474_v8 = vld [vmem:[%s1995_s8 + $0x4] sm:$0xf]  ;;  %v1417_v9 = vld [vmem:[%s1995_s8 + $0x8] sm:$0xf0]  ;;  %v1416_v10 = vor.u32 %v1475_v6, %v1415_v5  ;;  %v1405_v11 = vld [vmem:[%s1993_s6 + $0x10] sm:$0xf] }
  0x1d   : > { %694 = vmatpush.bf16.msra.mxu2 %v1424_v3  ;;  %v1473_v12 = vld [vmem:[%s1993_s6 + $0x14] sm:$0xf0]  ;;  %v1472_v13 = vld [vmem:[%s1993_s6 + $0x14] sm:$0xf]  ;;  %v1420_v14 = vor.u32 %v1474_v8, %v1417_v9  ;;  %s1717_s22 = scalar_select %p567_p3, %s1678_s29, 1  ;;  %vm624_vm0 = vcmask 261120  }
  0x1e   : > { %707 = vmatpush.bf16.msra.mxu3 %v1428_v7  ;;  %v1406_v15 = vor.u32 %v1473_v12, %v1405_v11  ;;  %v1407_v16 = vld [vmem:[%s1993_s6 + $0x18] sm:$0xf0]  ;;  %v1397_v17 = vld [vmem:[%s1993_s6] sm:$0xf]  ;;  %v1471_v19 = vld [vmem:[%s1993_s6 + $0x4] sm:$0xf0] }
  0x1f   : > { %v1410_v18 = vor.u32 %v1472_v13, %v1407_v16  ;;  %v1470_v20 = vld [vmem:[%s1993_s6 + $0x4] sm:$0xf]  ;;  %v1399_v21 = vld [vmem:[%s1993_s6 + $0x8] sm:$0xf0]  ;;  %s1735_s1 = sshll.u32 %s1717_s22, 2  ;;  %v1398_v22 = vor.u32 %v1471_v19, %v1397_v17  ;;  %s1393_s11 = sshll.u32 %s1717_s22, 1 }
  0x20   : > { %634 = vmatpush.bf16.msra.mxu0 %v1406_v15  ;;  %s574_s23 = scalar_lea.vmem %s1989_s2, %s1735_s1  ;;  %v1402_v23 = vor.u32 %v1470_v20, %v1399_v21  ;;  %s570_s27 = scalar_lea.vmem %s2009_s26, %s1735_s1  ;;  %v598_v26 = vld [vmem:[%s1994_s7] sm:$0x3]  ;;  %v1479_v27 = vld [vmem:[%s1997_s10 + $0x8] sm:$0xff]  ;;  %vm824_vm1 = vcmask 1043456   ;;  %vm1029_vm2 = vsmask.f32 2304 }
  0x21   : > { %695 = vmatpush.bf16.msra.mxu2 %v1416_v10  ;;  %647 = vmatpush.bf16.msra.mxu1 %v1410_v18  ;;  %v591_v24 = vld [vmem:[%s574_s23] sm:$0x7]  ;;  %s578_s18 = scalar_lea.vmem %s1990_s3, %s1393_s11  ;;  %v1481_v28 = vld [vmem:[%s2001_s14 + $0x8] sm:$0xff]  ;;  %v600_v31 = vperm.slane %v598_v26, 0  ;;  %v601_v35 = vperm.slane %v598_v26, 1  ;;  %vm983_vm3 = vcmask 1042432   ;;  %v846_v10 = vlaneseq  ;;  %s582_s25 = scalar_lea.vmem %s1991_s4, %s1735_s1 }
  0x22   : > { %708 = vmatpush.bf16.msra.mxu3 %v1420_v14  ;;  %v590_v25 = vld [vmem:[%s570_s27] sm:$0xf]  ;;  %vm1030_vm4 = vmand %vm983_vm3, %vm1029_vm2  ;;  %vm981_vm5 = vcmask 1041408   ;;  %v1575_v14 = vmov 65535   ;;  %s812_s26 = sadd.s32 1, %s1787_s21  ;;  %vm1074_vm8 = vcmask 76840   ;;  %s585_s19 = scalar_lea.vmem %s1992_s5, %s1717_s22 }
  0x23   : > { %v1762_v29 = vld [vmem:[%s578_s18] sm:$0x3]  ;;  %s1573_s18 = smov 96   ;;  %v1180_v15 = vsel %vm981_vm5, 4294967295, %v1575_v14  ;;  %v1797_v16 = vand.u32 127, %v846_v10  ;;  %s813_s29 = sld [smem:[#allocation3 + %s812_s26]] }
  0x24   : > { %1429 = vmatmul.msk.bf16.vlgmr.msra.gmra.mxu2 %vm624_vm0, %v591_v24  ;;  %635 = vmatpush.bf16.msra.mxu0 %v1398_v22  ;;  %v659_v30 = vld [vmem:[%s1996_s9] sm:$0x3]  ;;  %v751_v34 = vunpack.c.l.bf16 %v1762_v29  ;;  %v1181_v19 = vsel %vm983_vm3, %v1180_v15, 0  ;;  %s811_s1 = sld [smem:[#allocation3 + %s1787_s21]]  ;;  %vm878_vm11 = vcmask 126016   ;;  %vm1054_vm12 = vcmask 35840  }
  0x25   : > { %1430 = vmatmul.msk.bf16.vlgmr.msra.gmra.mxu3 %vm624_vm0, %v591_v24  ;;  %648 = vmatpush.bf16.msra.mxu1 %v1402_v23  ;;  %v1478_v32 = vld [vmem:[%s1997_s10] sm:$0xff]  ;;  %v661_v36 = vperm.slane %v659_v30, 0  ;;  %v662_v38 = vperm.slane %v659_v30, 1  ;;  %vm1048_vm6 = vcmp.ge.s32.totalorder %v1797_v16, 5  ;;  %v1576_v23 = vmov 0   ;;  %s1578_s23 = smov 123  }
  0x26   : > { %v1480_v33 = vld [vmem:[%s2001_s14] sm:$0xff]  ;;  %1510 = vtanh.f32 %v751_v34  ;;  %v1049_v24 = vsel %vm1048_vm6, 5, %v1576_v23  ;;  %vm848_vm9 = vcmp.ge.s32.totalorder %v1797_v16, 8  ;;  %vm1138_vm2 = vcmask 79912   ;;  %s814_s26 = sadd.s32 2, %s1787_s21  ;;  %s588_s21 = scalar_lea.vmem %s2004_s17, %s1717_s22 }
  0x27   : > { %1411 = vmatmul.msk.bf16.vlgmr.msra.gmra.mxu0 %vm624_vm0, %v590_v25  ;;  %v818_v18 = vld [vmem:[%s582_s25] sm:$0xf]  ;;  %vm925_vm6 = vcmask 63488   ;;  %s1902_s25 = sld [smem:[#allocation3 + %s816_s24]] }
  0x28   : > { %1412 = vmatmul.msk.bf16.vlgmr.msra.gmra.mxu1 %vm624_vm0, %v590_v25  ;;  %744 = vmatpush.bf16.msrb.mxu0 %v1479_v27  ;;  %v1050_v25 = vsub.s32 %v1797_v16, %v1049_v24 }
  0x29   : > { %783 = vmatpush.bf16.msrb.mxu1 %v1481_v28  ;;  %v1051_v26 = vstv %s813_s29  ;;  %s815_s29 = sld [smem:[#allocation3 + %s814_s26]] }
  0x2a   : > { %vm1805_vm7 = vcmp.ge.s32.totalorder %v1050_v25, %v1051_v26  ;;  %v851_v34 = vstv %s811_s1 }
  0x2c   : > { %745 = vmatpush.bf16.msrb.mxu0 %v1478_v32  ;;  %v1511_v46 = vpop.eup %1510 }
  0x2d   : > { %784 = vmatpush.bf16.msrb.mxu1 %v1480_v33  ;;  %v753_v49 = vpack.c.bf16 %v1511_v46, %v1511_v46 }
  0x38   : > { %1448 = vmatmul.msk.bf16.vlgmr.msrb.gmra.mxu1 %vm624_vm0, %v753_v49 }
  0xa4   : > { %v637_v37 = vpop.f32.mrf.mxu0 }
  0xa5   : > { %v638_v39 = vadd.f32 %v637_v37, %v600_v31  ;;  %v650_v40 = vpop.f32.mrf.mxu1  ;;  %v849_v31 = vsel %vm848_vm9, 8, %v1576_v23  ;;  %vm854_vm9 = vcmask 60416  }
  0xa6   : > { %v651_v41 = vadd.f32 %v650_v40, %v601_v35  ;;  %v850_v32 = vsub.s32 %v1797_v16, %v849_v31 }
  0xa7   : > { %v697_v42 = vpop.f32.mrf.mxu2 }
  0xa8   : > { %v698_v43 = vadd.f32 %v697_v42, %v661_v36  ;;  %v710_v44 = vpop.f32.mrf.mxu3  ;;  %v654_v45 = vpack.c.bf16 %v651_v41, %v638_v39  ;;  %vm1818_vm10 = vcmp.ge.s32.totalorder %v850_v32, %v851_v34  ;;  %v1509_v41 = vld [vmem:[%s2002_s15] ss:$0 sm:$0xff] }
  0xa9   : > { %v711_v47 = vadd.f32 %v710_v44, %v662_v38 }
  0xaa   : > { %v986_v48 = vunpack.c.h.b16 %v654_v45  ;;  %v820_v0 = vunpack.c.l.b16 %v654_v45 }
  0xab   : > { %v714_v50 = vpack.c.bf16 %v711_v47, %v698_v43 }
  0xac   : > { %v639_v51 = vpop.f32.mrf.mxu0  ;;  %v987_v52 = vpack.c.b16 %v986_v48, %v986_v48  ;;  %v821_v1 = vpack.c.b16 %v820_v0, %v820_v0 }
  0xad   : > { %v1015_v53 = vunpack.c.l.b16 %v714_v50  ;;  %v652_v54 = vpop.f32.mrf.mxu1  ;;  %v1174_v12 = vunpack.c.h.b16 %v714_v50  ;;  %v593_v51 = vld [vmem:[%s585_s19] sm:$0x1] }
  0xae   : > { %v993_v55 = vsel %vm824_vm1, %v987_v52, 0  ;;  %v715_v54 = vunpack.c.l.bf16 %v593_v51 }
  0xaf   : > { %v699_v56 = vpop.f32.mrf.mxu2  ;;  %v1016_v57 = vpack.c.b16 %v1015_v53, %v1015_v53  ;;  %1002 = vmatpush.bf16.msra.mxu0 %v993_v55  ;;  %v1175_v17 = vpack.c.b16 %v1174_v12, %v1174_v12 }
  0xb0   : > { %v712_v58 = vpop.f32.mrf.mxu3 }
  0xb1   : > { %v1018_v59 = vshrl.u32 %v1016_v57, 16  ;;  %v1021_v60 = vshll.u32 %v1016_v57, 16  ;;  %v1183_v22 = vand.u32 %v1181_v19, %v1175_v17  ;;  %v716_v57 = vmax.f32 %v715_v54, 0.0 }
  0xb3   : > { %v1020_v61 = vrot.slane %v1018_v59, 5  ;;  %v1023_v62 = vrot.slane %v1021_v60, 6  ;;  %v717_v60 = vpack.c.bf16 %v716_v57, %v716_v57 }
  0xb5   : > { %v1024_v63 = vor.u32 %v1023_v62, %v1020_v61  ;;  %v786_v8 = vpop.f32.mrf.mxu1  ;;  %1439 = vmatmul.msk.bf16.vlgmr.msrb.gmra.mxu0 %vm624_vm0, %v717_v60 }
  0xb6   : > { %v787_v42 = vadd.f32 %v1509_v41, %v786_v8 }
  0xb7   : > { %1025 = vrot.lane.b32.xlu0 %v1024_v63, %s1573_s18 }
  0xb8   : > { %v1449_v43 = vmul.f32 -1.442695, %v787_v42 }
  0xba   : > { %1512 = vpow2.f32 %v1449_v43 }
  0xbd   : > { %v788_v9 = vpop.f32.mrf.mxu1 }
  0xbf   : > { %822 = vrot.lane.b32.xlu0 %v821_v1, %s1573_s18 }
  0xc0   : > { %v1513_v44 = vpop.eup %1512 }
 0x129   : > { %v1026_v2 = vpop.permute.xlu0 %1025 }
 0x12a   : > { %v1031_v3 = vsel %vm1030_vm4, %v714_v50, %v1026_v2  ;;  %vm947_vm4 = vcmask 129088  }
 0x12b   : > { %1099 = vrot.lane.b32.xlu1 %v1031_v3, %s1574_s20  ;;  %v1033_v4 = vsel %vm624_vm0, %v1031_v3, 0 }
 0x12c   : > { %1042 = vmatpush.bf16.xpose.msra.mxu1 %v1033_v4 }
 0x131   : > { %v823_v5 = vpop.permute.xlu0 %822 }
 0x132   : > { %v827_v6 = vsel %vm824_vm1, %v654_v45, %v823_v5  ;;  %v793_v45 = vadd.f32 1.0, %v1513_v44 }
 0x133   : > { %903 = vrot.lane.b32.xlu1 %v827_v6, %s1574_s20  ;;  %v831_v7 = vsel %vm624_vm0, %v827_v6, 0  ;;  %1454 = vmatmul.msk.bf16.vlgmr.msra.gmra.mxu1 %vm624_vm0, %v1762_v29  ;;  %s1577_s20 = smov 120  }
 0x134   : > { %840 = vmatpush.bf16.xpose.msrb.mxu2 %v831_v7  ;;  %1514 = vrcp.f32 %v793_v45  ;;  %v805_v50 = vand.u32 2147483648, %v793_v45  ;;  %vm799_vm13 = vweird.f32 %v793_v45  ;;  %v803_v53 = vand.u32 2147483647, %v793_v45 }
 0x136   : > { %v806_v55 = vor.u32 1.1754944e-38, %v805_v50  ;;  %vm804_vm1 = vcmp.eq.f32.partialorder %v803_v53, 8.507059e+37 }
 0x13a   : > { %v1515_v46 = vpop.eup %1514 }
 0x13b   : > { %1451 = vmatmul.msk.bf16.vlgmr.msrb.gmra.mxu2 %vm624_vm0, %v1762_v29  ;;  %v795_v47 = vmul.f32 %v1515_v46, %v793_v45  ;;  %vm800_vm14 = vweird.f32 %v1515_v46 }
 0x13c   : > { %vm801_vm15 = vmor %vm799_vm13, %vm800_vm14 }
 0x13d   : > { %v796_v48 = vsub.f32 1.0, %v795_v47 }
 0x13f   : > { %v797_v49 = vmul.f32 %v1515_v46, %v796_v48 }
 0x141   : > { %v798_v52 = vadd.f32 %v1515_v46, %v797_v49 }
 0x143   : > { %v802_v56 = vsel %vm801_vm15, %v1515_v46, %v798_v52 }
 0x144   : > { %v807_v58 = vsel %vm804_vm1, %v806_v55, %v802_v56 }
 0x145   : > { %v809_v59 = vpack.c.bf16 %v807_v58, %v807_v58 }
 0x147   : > { %v1218_v61 = vsel %vm624_vm0, %v809_v59, 0  ;;  %v868_v59 = vstv %s1902_s25 }
 0x148   : > { %1227 = vmatpush.bf16.xpose.msrb.mxu0 %v1218_v61 }
 0x19d   : > { %v1100_v11 = vpop.permute.xlu1 %1099 }
 0x19e   : > { %v1102_v13 = vsel %vm624_vm0, %v1100_v11, 0 }
 0x19f   : > { %1111 = vmatpush.bf16.xpose.msra.mxu2 %v1102_v13 }
 0x1a5   : > { %v904_v20 = vpop.permute.xlu1 %903 }
 0x1a6   : > { %1455 = vmatmul.msk.bf16.vlgmr.msra.gmra.mxu2 %vm624_vm0, %v818_v18  ;;  %v909_v21 = vsel %vm624_vm0, %v904_v20, 0 }
 0x1a7   : > { %918 = vmatpush.bf16.xpose.msrb.mxu3 %v909_v21 }
 0x1ae   : > { %1452 = vmatmul.msk.bf16.vlgmr.msrb.gmra.mxu3 %vm624_vm0, %v818_v18 }
 0x1af   : > { %1192 = vmatpush.bf16.msra.mxu3 %v1183_v22 }
 0x1b0   : > { %v1044_v28 = vpop.f32.mrf.mxu1 }
 0x1b1   : > { %v1811_v29 = vsel %vm1805_vm7, -100.0, %v1044_v28 }
 0x1b2   : > { %v1075_v30 = vsel %vm1074_vm8, %v1811_v29, -inf  ;;  %v1055_v39 = vsel %vm1054_vm12, %v1811_v29, -inf }
 0x1b3   : > { %1076 = vmax.xlane.f32.xlu2 %v1075_v30 }
 0x1b8   : > { %v1046_v33 = vpop.f32.mrf.mxu1 }
 0x1be   : > { %v842_v36 = vpop.f32.mrf.mxu2 }
 0x1bf   : > { %v1824_v37 = vsel %vm1818_vm10, -100.0, %v842_v36 }
 0x1c0   : > { %v879_v38 = vsel %vm878_vm11, %v1824_v37, -inf  ;;  %v855_v35 = vsel %vm854_vm9, %v1824_v37, -inf }
 0x1c1   : > { %880 = vmax.xlane.f32.xlu0 %v879_v38 }
 0x1c6   : > { %v844_v40 = vpop.f32.mrf.mxu2 }
 0x1c9   : > { %1056 = vmax.xlane.f32.xlu0 %v1055_v39 }
 0x226   : > { %v1077_v11 = vpop.xlane.xlu2 %1076 }
 0x227   : > { %v1078_v13 = vsub.f32 %v1811_v29, %v1077_v11 }
 0x229   : > { %v1113_v62 = vpop.f32.mrf.mxu2  ;;  %v1079_v14 = vmul.f32 1.442695, %v1078_v13 }
 0x22a   : > { %v1841_v63 = vsel %vm1805_vm7, -100.0, %v1113_v62  ;;  %vm1118_vm7 = vcmask 38912  }
 0x22b   : > { %v1139_v0 = vsel %vm1138_vm2, %v1841_v63, -inf  ;;  %v1119_v12 = vsel %vm1118_vm7, %v1841_v63, -inf }
 0x22c   : > { %1140 = vmax.xlane.f32.xlu2 %v1139_v0 }
 0x231   : > { %v920_v1 = vpop.f32.mrf.mxu3  ;;  %v1115_v2 = vpop.f32.mrf.mxu2 }
 0x232   : > { %v1847_v3 = vsel %vm1818_vm10, -100.0, %v920_v1 }
 0x233   : > { %v948_v4 = vsel %vm947_vm4, %v1847_v3, -inf  ;;  %v926_v5 = vsel %vm925_vm6, %v1847_v3, -inf }
 0x234   : > { %949 = vmax.xlane.f32.xlu1 %v948_v4  ;;  %927 = vmax.xlane.f32.xlu0 %v926_v5  ;;  %v881_v6 = vpop.xlane.xlu0 %880 }
 0x235   : > { %v882_v7 = vsub.f32 %v1824_v37, %v881_v6 }
 0x237   : > { %v883_v8 = vmul.f32 1.442695, %v882_v7 }
 0x239   : > { %v922_v9 = vpop.f32.mrf.mxu3  ;;  %1516 = vpow2.f32 %v883_v8 }
 0x23a   : > { %1518 = vpow2.f32 %v1079_v14 }
 0x23c   : > { %1120 = vmax.xlane.f32.xlu1 %v1119_v12  ;;  %v1057_v26 = vpop.xlane.xlu0 %1056 }
 0x23d   : > { %v1058_v27 = vsub.f32 %v1811_v29, %v1057_v26 }
 0x23f   : > { %v1857_v15 = vpop.eup %1516  ;;  %v1059_v32 = vmul.f32 1.442695, %v1058_v27 }
 0x240   : > { %v1861_v17 = vpop.eup %1518 }
 0x244   : > { %886 = vrot.lane.b32.xlu2 %v1857_v15, %s1577_s20 }
 0x24c   : > { %1082 = vrot.lane.b32.xlu2 %v1861_v17, %s1578_s23 }
 0x29f   : > { %v1141_v18 = vpop.xlane.xlu2 %1140 }
 0x2a0   : > { %v1142_v19 = vsub.f32 %v1841_v63, %v1141_v18 }
 0x2a2   : > { %v1143_v20 = vmul.f32 1.442695, %v1142_v19 }
 0x2a4   : > { %1520 = vpow2.f32 %v1143_v20 }
 0x2a7   : > { %v950_v21 = vpop.xlane.xlu1 %949  ;;  %v887_v23 = vpop.permute.xlu2 %886 }
 0x2a8   : > { %v951_v22 = vsub.f32 %v1847_v3, %v950_v21  ;;  %v889_v33 = vsel %vm854_vm9, %v887_v23, 0.0  ;;  %v928_v42 = vpop.xlane.xlu0 %927 }
 0x2a9   : > { %v929_v43 = vsub.f32 %v1847_v3, %v928_v42  ;;  %v937_v3 = vstv %s815_s29 }
 0x2aa   : > { %v1867_v24 = vpop.eup %1520  ;;  %v952_v25 = vmul.f32 1.442695, %v951_v22 }
 0x2ab   : > { %1146 = vrot.lane.b32.xlu2 %v1867_v24, %s1578_s23  ;;  %v930_v46 = vmul.f32 1.442695, %v929_v43 }
 0x2ac   : > { %1522 = vpow2.f32 %v952_v25 }
 0x2ad   : > { %1524 = vpow2.f32 %v1059_v32 }
 0x2af   : > { %v1083_v28 = vpop.permute.xlu2 %1082  ;;  %v1121_v36 = vpop.xlane.xlu1 %1120 }
 0x2b0   : > { %v1085_v30 = vsel %vm1054_vm12, %v1083_v28, 0.0  ;;  %v1122_v38 = vsub.f32 %v1841_v63, %v1121_v36 }
 0x2b1   : > { %1086 = vadd.xlane.f32.xlu1 %v1085_v30 }
 0x2b2   : > { %v1873_v31 = vpop.eup %1522  ;;  %v1123_v41 = vmul.f32 1.442695, %v1122_v38 }
 0x2b3   : > { %955 = vrot.lane.b32.xlu2 %v1873_v31, %s1577_s20  ;;  %v1878_v34 = vpop.eup %1524 }
 0x2b4   : > { %v1061_v29 = vsel %vm1054_vm12, %v1878_v34, 0.0  ;;  %1526 = vpow2.f32 %v1123_v41 }
 0x2b5   : > { %1528 = vpow2.f32 %v930_v46 }
 0x2b9   : > { %890 = vadd.xlane.f32.xlu1 %v889_v33 }
 0x2ba   : > { %v1888_v47 = vpop.eup %1526 }
 0x2bb   : > { %v1125_v48 = vsel %vm1118_vm7, %v1888_v47, 0.0  ;;  %v1892_v49 = vpop.eup %1528 }
 0x2bc   : > { %v932_v50 = vsel %vm925_vm6, %v1892_v49, 0.0 }
 0x2c1   : > { %1062 = vadd.xlane.f32.xlu1 %v1061_v29 }
 0x2dc   : > { %856 = vmax.xlane.f32.xlu2 %v855_v35 }
 0x305   : > { %v1147_v39 = vpop.permute.xlu2 %1146 }
 0x306   : > { %v1149_v40 = vsel %vm1118_vm7, %v1147_v39, 0.0 }
 0x307   : > { %1150 = vadd.xlane.f32.xlu0 %v1149_v40 }
 0x30d   : > { %v956_v44 = vpop.permute.xlu2 %955 }
 0x30e   : > { %v958_v45 = vsel %vm925_vm6, %v956_v44, 0.0 }
 0x30f   : > { %959 = vadd.xlane.f32.xlu0 %v958_v45 }
 0x317   : > { %1126 = vadd.xlane.f32.xlu0 %v1125_v48 }
 0x31f   : > { %933 = vadd.xlane.f32.xlu0 %v932_v50 }
 0x324   : > { %v1087_v56 = vpop.xlane.xlu1 %1086 }
 0x32c   : > { %v891_v57 = vpop.xlane.xlu1 %890 }
 0x334   : > { %v1063_v46 = vpop.xlane.xlu1 %1062 }
 0x34f   : > { %v857_v51 = vpop.xlane.xlu2 %856 }
 0x350   : > { %v858_v52 = vsub.f32 %v1824_v37, %v857_v51  ;;  %v867_v37 = vshrl.u32 %v846_v10, 7 }
 0x352   : > { %v859_v53 = vmul.f32 1.442695, %v858_v52  ;;  %vm1910_vm10 = vcmp.ge.s32.totalorder %v867_v37, %v868_v59  ;;  %vm1921_vm13 = vcmp.ge.s32.totalorder %v867_v37, %v937_v3 }
 0x354   : > { %1530 = vpow2.f32 %v859_v53 }
 0x355   : > { %1532 = vrcp.f32 %v1087_v56 }
 0x356   : > { %1534 = vrcp.f32 %v891_v57 }
 0x35a   : > { %v1897_v54 = vpop.eup %1530 }
 0x35b   : > { %v861_v55 = vsel %vm854_vm9, %v1897_v54, 0.0  ;;  %v1533_v58 = vpop.eup %1532 }
 0x35c   : > { %862 = vadd.xlane.f32.xlu1 %v861_v55  ;;  %v1089_v60 = vmul.f32 %v1533_v58, %v1861_v17  ;;  %v1535_v63 = vpop.eup %1534 }
 0x35d   : > { %v893_v1 = vmul.f32 %v1535_v63, %v1857_v15 }
 0x35e   : > { %v1090_v62 = vsel %vm1910_vm10, 0.0, %v1089_v60 }
 0x35f   : > { %v1091_v0 = vsel %vm1074_vm8, %v1090_v62, 0.0  ;;  %v894_v4 = vsel %vm1910_vm10, 0.0, %v893_v1  ;;  %vm979_vm8 = vcmask 1040384  }
 0x360   : > { %v1092_v2 = vrot.slane %v1091_v0, 4  ;;  %v895_v7 = vsel %vm878_vm11, %v894_v4, 0.0  ;;  %vm988_vm11 = vcmask 64512  }
 0x361   : > { %v896_v12 = vrot.slane %v895_v7, 4 }
 0x362   : > { %v1093_v5 = vadd.f32 %v1092_v2, %v1091_v0 }
 0x363   : > { %v897_v20 = vadd.f32 %v896_v12, %v895_v7 }
 0x364   : > { %v1094_v14 = vrot.slane %v1093_v5, 2 }
 0x365   : > { %v898_v27 = vrot.slane %v897_v20, 2 }
 0x366   : > { %v1095_v18 = vadd.f32 %v1094_v14, %v1093_v5 }
 0x367   : > { %v899_v35 = vadd.f32 %v898_v27, %v897_v20 }
 0x368   : > { %v1096_v25 = vrot.slane %v1095_v18, 1 }
 0x36a   : > { %v1097_v33 = vadd.f32 %v1096_v25, %v1095_v18 }
 0x37a   : > { %v1151_v10 = vpop.xlane.xlu0 %1150 }
 0x37b   : > { %1536 = vrcp.f32 %v1151_v10 }
 0x381   : > { %v1537_v6 = vpop.eup %1536 }
 0x382   : > { %v1153_v9 = vmul.f32 %v1537_v6, %v1867_v24  ;;  %v960_v11 = vpop.xlane.xlu0 %959  ;;  %v747_v6 = vpop.f32.mrf.mxu0 }
 0x383   : > { %1538 = vrcp.f32 %v960_v11 }
 0x384   : > { %v1154_v13 = vsel %vm1921_vm13, 0.0, %v1153_v9 }
 0x385   : > { %v1155_v15 = vsel %vm1138_vm2, %v1154_v13, 0.0 }
 0x386   : > { %v1156_v17 = vrot.slane %v1155_v15, 4 }
 0x388   : > { %v1157_v19 = vadd.f32 %v1156_v17, %v1155_v15 }
 0x389   : > { %v1539_v21 = vpop.eup %1538 }
 0x38a   : > { %v962_v22 = vmul.f32 %v1539_v21, %v1873_v31  ;;  %v1158_v23 = vrot.slane %v1157_v19, 2  ;;  %v900_v31 = vrot.slane %v899_v35, 1  ;;  %v1127_v45 = vpop.xlane.xlu0 %1126  ;;  %v749_v17 = vpop.f32.mrf.mxu0 }
 0x38c   : > { %v963_v24 = vsel %vm1921_vm13, 0.0, %v962_v22  ;;  %v1159_v26 = vadd.f32 %v1158_v23, %v1157_v19  ;;  %v901_v42 = vadd.f32 %v900_v31, %v899_v35 }
 0x38d   : > { %v964_v28 = vsel %vm947_vm4, %v963_v24, 0.0 }
 0x38e   : > { %v965_v30 = vrot.slane %v964_v28, 4  ;;  %v1160_v32 = vrot.slane %v1159_v26, 1 }
 0x390   : > { %v1161_v29 = vadd.f32 %v1160_v32, %v1159_v26  ;;  %v966_v36 = vadd.f32 %v965_v30, %v964_v28 }
 0x392   : > { %v1499_v38 = vpack.i.bf16 %v1161_v29, %v1097_v33  ;;  %v967_v39 = vrot.slane %v966_v36, 2  ;;  %v934_v48 = vpop.xlane.xlu0 %933 }
 0x394   : > { %1500 = vrot.lane.b32.xlu1 %v1499_v38, %s1578_s23  ;;  %v968_v40 = vadd.f32 %v967_v39, %v966_v36 }
 0x396   : > { %v969_v41 = vrot.slane %v968_v40, 1 }
 0x398   : > { %v970_v43 = vadd.f32 %v969_v41, %v968_v40 }
 0x39a   : > { %v1504_v44 = vpack.i.bf16 %v970_v43, %v901_v42 }
 0x39c   : > { %1505 = vrot.lane.b32.xlu2 %v1504_v44, %s1577_s20  ;;  %s2018_s20 = sld [smem:[#allocation7_spill]] }
 0x3cf   : > { %v863_v50 = vpop.xlane.xlu1 %862 }
 0x3d0   : > { %1540 = vrcp.f32 %v863_v50 }
 0x3d1   : > { %1542 = vrcp.f32 %v934_v48 }
 0x3d2   : > { %1544 = vrcp.f32 %v1063_v46 }
 0x3d3   : > { %1546 = vrcp.f32 %v1127_v45 }
 0x3d6   : > { %v1541_v51 = vpop.eup %1540 }
 0x3d7   : > { %v1543_v52 = vpop.eup %1542  ;;  %v865_v53 = vmul.f32 %v1541_v51, %v1897_v54  ;;  %v1483_v51 = vld [vmem:[%s1999_s12 + $0x8] sm:$0xff] }
 0x3d8   : > { %v936_v55 = vmul.f32 %v1543_v52, %v1892_v49  ;;  %v1545_v63 = vpop.eup %1544  ;;  %1263 = vmatpush.bf16.msrb.mxu1 %v1483_v51  ;;  %v1482_v52 = vld [vmem:[%s1999_s12] sm:$0xff] }
 0x3d9   : > { %v870_v56 = vsel %vm1910_vm10, 0.0, %v865_v53  ;;  %v1547_v0 = vpop.eup %1546  ;;  %v1065_v49 = vmul.f32 %v1545_v63, %v1878_v34  ;;  %v1271_v53 = vld [vmem:[%s2003_s16] sm:$0x3] }
 0x3da   : > { %v939_v57 = vsel %vm1921_vm13, 0.0, %v936_v55  ;;  %v871_v58 = vsel %vm854_vm9, %v870_v56, 0.0  ;;  %v1129_v10 = vmul.f32 %v1547_v0, %v1888_v47  ;;  %v1277_v55 = vsel %vm981_vm5, %v1271_v53, 0  ;;  %v722_v56 = vld [vmem:[%s2018_s20] sm:$0x1] }
 0x3db   : > { %v940_v37 = vsel %vm925_vm6, %v939_v57, 0.0  ;;  %v872_v60 = vrot.slane %v871_v58, 4  ;;  %v1066_v4 = vsel %vm1910_vm10, 0.0, %v1065_v49  ;;  %1286 = vmatpush.bf16.msrb.mxu2 %v1277_v55 }
 0x3dc   : > { %v941_v62 = vrot.slane %v940_v37, 4  ;;  %v1130_v5 = vsel %vm1921_vm13, 0.0, %v1129_v10  ;;  %v1067_v9 = vsel %vm1054_vm12, %v1066_v4, 0.0  ;;  %vm1176_vm12 = vcmask 39936   ;;  %1264 = vmatpush.bf16.msrb.mxu1 %v1482_v52 }
 0x3dd   : > { %v873_v1 = vadd.f32 %v872_v60, %v871_v58  ;;  %v1131_v12 = vsel %vm1118_vm7, %v1130_v5, 0.0  ;;  %v1068_v13 = vrot.slane %v1067_v9, 4  ;;  %v748_v58 = vadd.f32 %v747_v6, %v722_v56 }
 0x3de   : > { %v942_v54 = vadd.f32 %v941_v62, %v940_v37  ;;  %v1132_v34 = vrot.slane %v1131_v12, 4 }
 0x3df   : > { %v874_v2 = vrot.slane %v873_v1, 2  ;;  %v1069_v18 = vadd.f32 %v1068_v13, %v1067_v9  ;;  %v1207_v63 = vrot.slane %v748_v58, 7 }
 0x3e0   : > { %v943_v3 = vrot.slane %v942_v54, 2  ;;  %v1133_v20 = vadd.f32 %v1132_v34, %v1131_v12  ;;  %v1241_v12 = vld [vmem:[%s2000_s13] sm:$0x1] }
 0x3e1   : > { %v875_v7 = vadd.f32 %v874_v2, %v873_v1  ;;  %v1070_v24 = vrot.slane %v1069_v18, 2 }
 0x3e2   : > { %v944_v11 = vadd.f32 %v943_v3, %v942_v54  ;;  %v1134_v26 = vrot.slane %v1133_v20, 2 }
 0x3e3   : > { %v876_v14 = vrot.slane %v875_v7, 1  ;;  %v1071_v28 = vadd.f32 %v1070_v24, %v1069_v18 }
 0x3e4   : > { %v945_v15 = vrot.slane %v944_v11, 1  ;;  %v1135_v30 = vadd.f32 %v1134_v26, %v1133_v20 }
 0x3e5   : > { %v877_v19 = vadd.f32 %v876_v14, %v875_v7  ;;  %v1072_v32 = vrot.slane %v1071_v28, 1 }
 0x3e6   : > { %v946_v8 = vadd.f32 %v945_v15, %v944_v11  ;;  %v1136_v33 = vrot.slane %v1135_v30, 1 }
 0x3e7   : > { %v1073_v35 = vadd.f32 %v1072_v32, %v1071_v28 }
 0x3e8   : > { %v1137_v38 = vadd.f32 %v1136_v33, %v1135_v30 }
 0x3f6   : > { %v1506_v47 = vpop.permute.xlu2 %1505 }
 0x3f7   : > { %v1507_v61 = vunpack.i.l.bf16 %v1506_v47  ;;  %v1508_v21 = vunpack.i.h.bf16 %v1506_v47 }
 0x3f9   : > { %v980_v22 = vsel %vm979_vm8, %v877_v19, %v1507_v61 }
 0x3fa   : > { %v982_v23 = vsel %vm981_vm5, %v980_v22, %v946_v8 }
 0x3fb   : > { %v984_v25 = vsel %vm983_vm3, %v982_v23, %v1508_v21 }
 0x3fc   : > { %v985_v27 = vpack.c.bf16 %v984_v25, %v984_v25 }
 0x3fe   : > { %1453 = vmatmul.msk.bf16.vlgmr.msra.gmra.mxu0 %vm988_vm11, %v985_v27 }
 0x406   : > { %v1501_v29 = vpop.permute.xlu1 %1500 }
 0x407   : > { %v1502_v36 = vunpack.i.l.bf16 %v1501_v29  ;;  %v1503_v39 = vunpack.i.h.bf16 %v1501_v29 }
 0x409   : > { %v1170_v31 = vsel %vm979_vm8, %v1073_v35, %v1502_v36 }
 0x40a   : > { %v1171_v40 = vsel %vm981_vm5, %v1170_v31, %v1137_v38  ;;  %vm1272_vm5 = vcmask 31744  }
 0x40b   : > { %v1172_v41 = vsel %vm983_vm3, %v1171_v40, %v1503_v39  ;;  %vm1233_vm3 = vcmp.ge.s32.totalorder %v1797_v16, %v868_v59 }
 0x40c   : > { %v1173_v42 = vpack.c.bf16 %v1172_v41, %v1172_v41 }
 0x40e   : > { %1456 = vmatmul.msk.bf16.vlgmr.msra.gmra.mxu3 %vm1176_vm12, %v1173_v42 }
 0x47b   : > { %v1004_v43 = vpop.f32.mrf.mxu0 }
 0x47c   : > { %v1009_v44 = vrot.slane %v1004_v43, 2 }
 0x47e   : > { %1010 = vrot.lane.b32.xlu0 %v1009_v44, %s1573_s18 }
 0x483   : > { %v1006_v45 = vpop.f32.mrf.mxu0 }
 0x491   : > { %v1194_v46 = vpop.f32.mrf.mxu3 }
 0x492   : > { %v1199_v48 = vrot.slane %v1194_v46, 2 }
 0x494   : > { %1200 = vrot.lane.b32.xlu1 %v1199_v48, %s1573_s18 }
 0x499   : > { %v1196_v50 = vpop.f32.mrf.mxu3 }
 0x4f0   : > { %v1011_v57 = vpop.permute.xlu0 %1010 }
 0x4f1   : > { %v1013_v60 = vadd.f32 %v1011_v57, %v1004_v43 }
 0x506   : > { %v1201_v37 = vpop.permute.xlu1 %1200 }
 0x507   : > { %v1203_v62 = vadd.f32 %v1201_v37, %v1194_v46 }
 0x509   : > { %v1204_v0 = vadd.f32 %v1203_v62, %v1013_v60 }
 0x50b   : > { %v1205_v1 = vadd.f32 %v1204_v0, %v748_v58  ;;  %v1209_v54 = vadd.f32 %v1207_v63, %v1204_v0 }
 0x50d   : > { %v1210_v49 = vpack.c.bf16 %v1209_v54, %v1209_v54  ;;  %1548 = vtanh.f32 %v1205_v1 }
 0x50f   : > { %v1212_v10 = vshrl.u32 %v1210_v49, 16 }
 0x511   : > { %1457 = vmatmul.msk.bf16.vlgmr.msrb.gmra.mxu0 %vm624_vm0, %v1212_v10 }
 0x513   : > { %v1549_v2 = vpop.eup %1548 }
 0x514   : > { %v1236_v3 = vpack.c.bf16 %v1549_v2, %v1549_v2 }
 0x516   : > { %1466 = vmatmul.msk.bf16.vlgmr.msrb.gmra.mxu1 %vm624_vm0, %v1236_v3 }
 0x58e   : > { %v1229_v4 = vpop.f32.mrf.mxu0 }
 0x58f   : > { %v1234_v5 = vsel %vm1233_vm3, -100.0, %v1229_v4 }
 0x590   : > { %v1270_v6 = vpack.c.bf16 %v1234_v5, %v1234_v5 }
 0x592   : > { %1467 = vmatmul.msk.bf16.vlgmr.msrb.gmra.mxu2 %vm1272_vm5, %v1270_v6 }
 0x593   : > { %v1266_v7 = vpop.f32.mrf.mxu1 }
 0x594   : > { %v1267_v13 = vadd.f32 %v1266_v7, %v1241_v12 }
 0x596   : > { %v1231_v9 = vpop.f32.mrf.mxu0 }
 0x59b   : > { %v1268_v11 = vpop.f32.mrf.mxu1 }
 0x615   : > { %v1288_v14 = vpop.f32.mrf.mxu2 }
 0x616   : > { %v1292_v34 = vadd.f32 %v1288_v14, %v1267_v13 }
 0x618   : > { %1293 = vst [vmem:[%s588_s21] sm:$0x1] %v1292_v34 }
 0x61d   : > { %v1290_v16 = vpop.f32.mrf.mxu2 }
 0x61e PF: > { %s35_s28 = sadd.s32 1, %s1570_s28  }
 0x61f   : > { %p32_p4 = scmp.ge.s32.totalorder %s35_s28, 4  }
 0x621   :  { %34 = sbr.rel (!%p32_p4) target bundleno = 16 (0x10), region = 126 }

</bundles_post_ra>
